<compile_context>
chip_gen: v5e
topology: v5e:2x2
jax: 0.10.0
libtpu: 0.0.40
codegen_flags: <defaults>
</compile_context>

<pallas_src>
import math
import numpy as np

import jax
import jax.numpy as jnp
from jax.experimental import pallas as pl
from jax.experimental.pallas import tpu as pltpu


# ----------------------------------------------------------------------------
# Space-filling-curve construction (host-side, static index tables)
# TODO(synk): the original `peano_curve` / `embed_and_prune_sfc` sources were
# not provided; a standard recursive Peano curve on the smallest 3^k x 3^k
# grid, pruned to the n x n grid, is used as a stand-in.
# ----------------------------------------------------------------------------
def peano_curve(order):
    if order == 0:
        return [(0, 0)]
    sub = peano_curve(order - 1)
    m = 3 ** (order - 1)
    pts = []
    for X in range(3):
        ys = range(3) if X % 2 == 0 else range(2, -1, -1)
        for Y in ys:
            flip_r = (Y % 2 == 1)
            flip_c = (X % 2 == 1)
            for (r, c) in sub:
                rr = (m - 1 - r) if flip_r else r
                cc = (m - 1 - c) if flip_c else c
                pts.append((X * m + rr, Y * m + cc))
    return pts


def embed_and_prune_sfc(curve_fn, n_rows, n_cols):
    order = 0
    while 3 ** order < max(n_rows, n_cols):
        order += 1
    return [(r, c) for (r, c) in curve_fn(order) if r < n_rows and c < n_cols]


def sfc_indices(grid_size):
    curve = embed_and_prune_sfc(peano_curve, grid_size, grid_size)
    return np.asarray([r * grid_size + c for (r, c) in curve], dtype=np.int32)


# ----------------------------------------------------------------------------
# F.interpolate(mode='linear', align_corners=False) as a dense static matrix.
# Rows sum to 1 -> interpolation commutes with the bias add.
# TODO(synk): verified only for the upsampling case used by this module; for
# large n the 2-tap structure should become an in-kernel VPU lerp instead.
# ----------------------------------------------------------------------------
def interp_matrix(out_size, in_size):
    W = np.zeros((out_size, in_size), dtype=np.float32)
    scale = in_size / out_size
    for j in range(out_size):
        src = max((j + 0.5) * scale - 0.5, 0.0)
        i0 = min(int(math.floor(src)), in_size - 1)
        i1 = min(i0 + 1, in_size - 1)
        lam = src - i0
        W[j, i0] += 1.0 - lam
        W[j, i1] += lam
    return W


# ----------------------------------------------------------------------------
# XLA-side glue: rearrange 'b c (h p1)(w p2) -> b (h w) (p1 p2 c)', SFC gather,
# grouping of consecutive curve patches.
# ----------------------------------------------------------------------------
def level_features(x, lvl):
    B, C, H, W = x.shape
    p = lvl["pre_patch_size"]
    g = lvl["group"]
    h, w = H // p, W // p
    t = x.reshape(B, C, h, p, w, p).transpose(0, 2, 4, 3, 5, 1)
    t = t.reshape(B, h * w, p * p * C)
    t = jnp.take(t, lvl["sfc"], axis=1)              # SFC reorder of pre-patches
    return t.reshape(B, (h * w) // g, g * p * p * C)


# ----------------------------------------------------------------------------
# The fused kernel: all level projections + token interpolation + fusion linear
# for one batch element per grid step.  Everything between the bf16 level
# inputs and the final f32 output stays in VMEM / vregs.
# ----------------------------------------------------------------------------
def _make_fused_kernel(L):
    def kernel(*refs):
        xs = refs[0:L]                 # (1, n_l, K_l)  bf16
        ws = refs[L:2 * L]             # (K_l, E)       bf16
        bs = refs[2 * L:3 * L]         # (1, E)         f32
        ts = refs[3 * L:4 * L - 1]     # (n_tok, n_l)   bf16, levels 1..L-1
        wf_ref = refs[4 * L - 1]       # (L, E, D)      bf16
        bf_ref = refs[4 * L]           # (1, D)         f32
        o_ref = refs[4 * L + 1]        # (1, n_tok, D)  f32

        acc = None
        for l in range(L):
            # projection: one flattened MXU dot per level (bf16 x bf16 -> f32)
            z = jnp.dot(xs[l][0], ws[l][...],
                        preferred_element_type=jnp.float32)           # (n_l, E)
            z = z + bs[l][...]                                        # bias (f32)
            if l > 0:
                # fused token interpolation; both operands bf16, f32 accumulate
                z = jnp.dot(ts[l - 1][...], z.astype(jnp.bfloat16),
                            preferred_element_type=jnp.float32)       # (n_tok, E)
            feat = z.astype(jnp.bfloat16)
            # fusion linear: Wf passed as (L, E, D), static leading index only
            part = jnp.dot(feat, wf_ref[l],
                           preferred_element_type=jnp.float32)        # (n_tok, D)
            acc = part if acc is None else acc + part
        o_ref[0] = acc + bf_ref[...]
    return kernel


def hierarchical_forward(x, params, single_buffer_consts=True):
    levels = params["levels"]
    L = len(levels)
    E = params["embed_dim"]
    n_tok = params["n_tokens"]
    D = E * L
    B = x.shape[0]

    # bf16 at the kernel boundary; cast once, before the patchify glue, so the
    # gather/reshape moves half the bytes.
    x_bf = x.astype(jnp.bfloat16)
    xs = [level_features(x_bf, lvl) for lvl in levels]     # (B, n_l, K_l) bf16
    n_list = [int(t.shape[1]) for t in xs]
    k_list = [int(t.shape[2]) for t in xs]

    w_list = [lvl["W_bf16"] for lvl in levels]             # (K_l, E) bf16
    b_list = [lvl["b"].reshape(1, E) for lvl in levels]    # (1, E)   f32
    t_list = [params["interp_bf16"][l] for l in range(1, L)]
    wf3 = params["Wf3_bf16"]                               # (L, E, D) bf16
    bf2 = params["bf"].reshape(1, D)                       # (1, D)    f32

    # Grid-constant (weight / bias / interp) blocks: VMEM resident and
    # single-buffered -- they are never re-fetched across grid steps.
    if single_buffer_consts:
        def const_spec(shape):
            return pl.BlockSpec(shape, lambda *_: (0,) * len(shape),
                                pipeline_mode=pl.Buffered(1))
    else:
        def const_spec(shape):
            return pl.BlockSpec(shape, lambda *_: (0,) * len(shape))

    in_specs = []
    in_specs += [pl.BlockSpec((1, n_list[l], k_list[l]), lambda i: (i, 0, 0))
                 for l in range(L)]
    in_specs += [const_spec((k_list[l], E)) for l in range(L)]
    in_specs += [const_spec((1, E)) for _ in range(L)]
    in_specs += [const_spec((n_tok, n_list[l])) for l in range(1, L)]
    in_specs += [const_spec((L, E, D)), const_spec((1, D))]

    out_specs = pl.BlockSpec((1, n_tok, D), lambda i: (i, 0, 0))

    # Advisory cost hint so XLA can schedule / overlap the patchify glue.
    flops = 0
    for l in range(L):
        flops += 2 * B * n_list[l] * k_list[l] * E          # projection
        if l > 0:
            flops += 2 * B * n_tok * n_list[l] * E          # interpolation
        flops += 2 * B * n_tok * E * D                      # fusion partial
    bytes_accessed = (sum(int(np.prod(t.shape)) for t in xs) * 2
                      + sum(k_list) * E * 2 + L * E * 4
                      + sum(n_tok * n_list[l] for l in range(1, L)) * 2
                      + L * E * D * 2 + D * 4
                      + B * n_tok * D * 4)

    out = pl.pallas_call(
        _make_fused_kernel(L),
        out_shape=jax.ShapeDtypeStruct((B, n_tok, D), jnp.float32),
        grid=(B,),
        in_specs=in_specs,
        out_specs=out_specs,
        compiler_params=pltpu.CompilerParams(
            dimension_semantics=("parallel",)),
        cost_estimate=pl.CostEstimate(flops=int(flops), transcendentals=0,
                                      bytes_accessed=int(bytes_accessed)),
    )(*xs, *w_list, *b_list, *t_list, wf3, bf2)
    return out


# ----------------------------------------------------------------------------
# Parameters + pure-JAX references
# ----------------------------------------------------------------------------
def init_params(img_size, in_channels, patch_size_list, embed_dim, key):
    levels = []
    pre_patch_size = 1
    for patch_size in patch_size_list:
        assert img_size % pre_patch_size == 0
        grid_size = img_size // pre_patch_size
        n_pre = grid_size * grid_size
        assert n_pre % patch_size == 0
        input_dim = in_channels * pre_patch_size * pre_patch_size * patch_size
        key, kw, kb = jax.random.split(key, 3)
        W = 0.02 * jax.random.normal(kw, (input_dim, embed_dim), jnp.float32)
        b = 0.02 * jax.random.normal(kb, (embed_dim,), jnp.float32)
        levels.append(dict(
            pre_patch_size=pre_patch_size,
            group=patch_size,
            grid_size=grid_size,
            n_final=n_pre // patch_size,
            sfc=jnp.asarray(sfc_indices(grid_size)),
            W=W, b=b, W_bf16=W.astype(jnp.bfloat16),
        ))
        pre_patch_size *= 2

    # integer math instead of float sqrt (review correctness item)
    patch_list = [
        (img_size // lvl["pre_patch_size"] // math.isqrt(lvl["group"])) ** 2
        for lvl in levels
    ]
    n_tokens = levels[0]["n_final"]
    assert n_tokens == patch_list[0]

    L = len(levels)
    interp = [None]
    interp_bf16 = [None]
    for l in range(1, L):
        T = jnp.asarray(interp_matrix(n_tokens, levels[l]["n_final"]))
        interp.append(T)
        interp_bf16.append(T.astype(jnp.bfloat16))

    E = embed_dim
    D = E * L
    key, kw, kb = jax.random.split(key, 3)
    Wf = 0.02 * jax.random.normal(kw, (D, D), jnp.float32)     # stored as (in, out)
    bf = 0.02 * jax.random.normal(kb, (D,), jnp.float32)
    return dict(
        levels=levels, interp=interp, interp_bf16=interp_bf16,
        patch_list=patch_list, n_tokens=n_tokens, embed_dim=E,
        Wf=Wf, bf=bf,
        Wf3_bf16=Wf.reshape(L, E, D).astype(jnp.bfloat16),
    )


def hierarchical_forward_ref(x, params, use_bf16=True):
    """Pure-JAX reference.  use_bf16=True mirrors the kernel's quantization
    points exactly (bf16 matmul operands, f32 accumulation); use_bf16=False is
    the original full-f32 module math."""
    cast = (lambda a: a.astype(jnp.bfloat16)) if use_bf16 else (lambda a: a)
    E = params["embed_dim"]
    acc = None
    for l, lvl in enumerate(params["levels"]):
        t = cast(level_features(x, lvl))
        z = jnp.einsum("bnk,ke->bne", t, cast(lvl["W"]),
                       preferred_element_type=jnp.float32) + lvl["b"]
        if l > 0:
            z = jnp.einsum("tn,bne->bte", cast(params["interp"][l]), cast(z),
                           preferred_element_type=jnp.float32)
        feat = cast(z)
        wl = cast(params["Wf"][l * E:(l + 1) * E, :])
        part = jnp.einsum("bne,ed->bnd", feat, wl,
                          preferred_element_type=jnp.float32)
        acc = part if acc is None else acc + part
    return acc + params["bf"]


if __name__ == "__main__":
    # img_size=16, in_channels=4, patch_size_list=[4,4,4], embed_dim=32
    #   level 0: pre=1, grid 16x16 -> 256 pre-patches, groups of 4 -> 64 tokens, K=16
    #   level 1: pre=2, grid  8x8  ->  64 pre-patches, groups of 4 -> 16 tokens, K=64
    #   level 2: pre=4, grid  4x4  ->  16 pre-patches, groups of 4 ->  4 tokens, K=256
    #   fused embed dim D = 32 * 3 = 96 ; output (B, 64, 96) float32
    B, C, img_size = 2, 4, 16
    patch_size_list = [4, 4, 4]
    embed_dim = 32

    key = jax.random.PRNGKey(0)
    key, kx = jax.random.split(key)
    x = jax.random.normal(kx, (B, C, img_size, img_size), jnp.float32)
    params = init_params(img_size, C, patch_size_list, embed_dim, key)

    try:
        fwd = jax.jit(lambda xx: hierarchical_forward(xx, params, True))
        out = jax.block_until_ready(fwd(x))
    except Exception:
        # TODO(synk): single-buffered constant blocks (pl.Buffered(1)) not
        # accepted by this jax version; fall back to default double-buffering.
        fwd = jax.jit(lambda xx: hierarchical_forward(xx, params, False))
        out = jax.block_until_ready(fwd(x))

    ref_bf16 = jax.block_until_ready(hierarchical_forward_ref(x, params, True))
    ref_f32 = jax.block_until_ready(hierarchical_forward_ref(x, params, False))

    n_tok = params["n_tokens"]
    D = embed_dim * len(patch_size_list)
    assert out.shape == (B, n_tok, D)
    assert out.dtype == jnp.float32
    # exact-numerics check against the bf16-operand / f32-accumulate reference
    assert jnp.allclose(out, ref_bf16, atol=2e-3, rtol=2e-3), \
        float(jnp.max(jnp.abs(out - ref_bf16)))
    # semantic check against the original full-f32 module math
    assert jnp.allclose(out, ref_f32, atol=2e-2, rtol=2e-2), \
        float(jnp.max(jnp.abs(out - ref_f32)))

    print("KERNEL_OK")
</pallas_src>

<mosaic_0001>
module attributes {stable_mosaic.version = 11 : i64} {
  func.func @kernel(%arg0: i32, %arg1: memref<1x64x16xbf16, #tpu.memory_space<vmem>>, %arg2: memref<1x16x64xbf16, #tpu.memory_space<vmem>>, %arg3: memref<1x4x256xbf16, #tpu.memory_space<vmem>>, %arg4: memref<16x32xbf16, #tpu.memory_space<vmem>>, %arg5: memref<64x32xbf16, #tpu.memory_space<vmem>>, %arg6: memref<256x32xbf16, #tpu.memory_space<vmem>>, %arg7: memref<1x32xf32, #tpu.memory_space<vmem>>, %arg8: memref<1x32xf32, #tpu.memory_space<vmem>>, %arg9: memref<1x32xf32, #tpu.memory_space<vmem>>, %arg10: memref<64x16xbf16, #tpu.memory_space<vmem>>, %arg11: memref<64x4xbf16, #tpu.memory_space<vmem>>, %arg12: memref<3x32x96xbf16, #tpu.memory_space<vmem>>, %arg13: memref<1x96xf32, #tpu.memory_space<vmem>>, %arg14: memref<1x64x96xf32, #tpu.memory_space<vmem>>) attributes {dimension_semantics = [#tpu.dimension_semantics<parallel>], iteration_bounds = array<i64: 2>, scalar_prefetch = 0 : i64, scratch_operands = 0 : i64, tpu.core_type = #tpu.core_type<tc>, window_params = [{transform_indices = @transform_0, window_bounds = array<i64: 1, 64, 16>}, {transform_indices = @transform_1, window_bounds = array<i64: 1, 16, 64>}, {transform_indices = @transform_2, window_bounds = array<i64: 1, 4, 256>}, {pipeline_mode = #tpu.pipeline_mode<synchronous>, transform_indices = @transform_3, window_bounds = array<i64: 16, 32>}, {pipeline_mode = #tpu.pipeline_mode<synchronous>, transform_indices = @transform_4, window_bounds = array<i64: 64, 32>}, {pipeline_mode = #tpu.pipeline_mode<synchronous>, transform_indices = @transform_5, window_bounds = array<i64: 256, 32>}, {pipeline_mode = #tpu.pipeline_mode<synchronous>, transform_indices = @transform_6, window_bounds = array<i64: 1, 32>}, {pipeline_mode = #tpu.pipeline_mode<synchronous>, transform_indices = @transform_7, window_bounds = array<i64: 1, 32>}, {pipeline_mode = #tpu.pipeline_mode<synchronous>, transform_indices = @transform_8, window_bounds = array<i64: 1, 32>}, {pipeline_mode = #tpu.pipeline_mode<synchronous>, transform_indices = @transform_9, window_bounds = array<i64: 64, 16>}, {pipeline_mode = #tpu.pipeline_mode<synchronous>, transform_indices = @transform_10, window_bounds = array<i64: 64, 4>}, {pipeline_mode = #tpu.pipeline_mode<synchronous>, transform_indices = @transform_11, window_bounds = array<i64: 3, 32, 96>}, {pipeline_mode = #tpu.pipeline_mode<synchronous>, transform_indices = @transform_12, window_bounds = array<i64: 1, 96>}, {transform_indices = @transform_13, window_bounds = array<i64: 1, 64, 96>}]} {
    %c0 = arith.constant 0 : index
    %c0_0 = arith.constant 0 : index
    %c0_1 = arith.constant 0 : index
    %0 = vector.load %arg1[%c0, %c0_0, %c0_1] : memref<1x64x16xbf16, #tpu.memory_space<vmem>>, vector<1x64x16xbf16>
    %1 = vector.shape_cast %0 : vector<1x64x16xbf16> to vector<64x16xbf16>
    %c0_2 = arith.constant 0 : index
    %c0_3 = arith.constant 0 : index
    %2 = vector.load %arg4[%c0_2, %c0_3] : memref<16x32xbf16, #tpu.memory_space<vmem>>, vector<16x32xbf16>
    %cst = arith.constant dense<0.000000e+00> : vector<64x32xf32>
    %3 = tpu.matmul %1, %2, %cst {dimension_numbers = #tpu.dot_dimension_numbers<[1], [0], [0], [1], [0, 0, 1, 1], [], []>} : vector<64x16xbf16>, vector<16x32xbf16>, vector<64x32xf32> -> vector<64x32xf32>
    %c0_4 = arith.constant 0 : index
    %c0_5 = arith.constant 0 : index
    %4 = vector.load %arg7[%c0_4, %c0_5] : memref<1x32xf32, #tpu.memory_space<vmem>>, vector<1x32xf32>
    %5 = vector.broadcast %4 : vector<1x32xf32> to vector<64x32xf32>
    %6 = arith.addf %3, %5 : vector<64x32xf32>
    %7 = arith.truncf %6 : vector<64x32xf32> to vector<64x32xbf16>
    %c0_6 = arith.constant 0 : index
    %c0_7 = arith.constant 0 : index
    %c0_8 = arith.constant 0 : index
    %8 = vector.load %arg12[%c0_6, %c0_7, %c0_8] : memref<3x32x96xbf16, #tpu.memory_space<vmem>>, vector<1x32x96xbf16>
    %9 = vector.shape_cast %8 : vector<1x32x96xbf16> to vector<32x96xbf16>
    %cst_9 = arith.constant dense<0.000000e+00> : vector<64x96xf32>
    %10 = tpu.matmul %7, %9, %cst_9 {dimension_numbers = #tpu.dot_dimension_numbers<[1], [0], [0], [1], [0, 0, 1, 1], [], []>} : vector<64x32xbf16>, vector<32x96xbf16>, vector<64x96xf32> -> vector<64x96xf32>
    %c0_10 = arith.constant 0 : index
    %c0_11 = arith.constant 0 : index
    %c0_12 = arith.constant 0 : index
    %11 = vector.load %arg2[%c0_10, %c0_11, %c0_12] : memref<1x16x64xbf16, #tpu.memory_space<vmem>>, vector<1x16x64xbf16>
    %12 = vector.shape_cast %11 : vector<1x16x64xbf16> to vector<16x64xbf16>
    %c0_13 = arith.constant 0 : index
    %c0_14 = arith.constant 0 : index
    %13 = vector.load %arg5[%c0_13, %c0_14] : memref<64x32xbf16, #tpu.memory_space<vmem>>, vector<64x32xbf16>
    %cst_15 = arith.constant dense<0.000000e+00> : vector<16x32xf32>
    %14 = tpu.matmul %12, %13, %cst_15 {dimension_numbers = #tpu.dot_dimension_numbers<[1], [0], [0], [1], [0, 0, 1, 1], [], []>} : vector<16x64xbf16>, vector<64x32xbf16>, vector<16x32xf32> -> vector<16x32xf32>
    %c0_16 = arith.constant 0 : index
    %c0_17 = arith.constant 0 : index
    %15 = vector.load %arg8[%c0_16, %c0_17] : memref<1x32xf32, #tpu.memory_space<vmem>>, vector<1x32xf32>
    %16 = vector.broadcast %15 : vector<1x32xf32> to vector<16x32xf32>
    %17 = arith.addf %14, %16 : vector<16x32xf32>
    %c0_18 = arith.constant 0 : index
    %c0_19 = arith.constant 0 : index
    %18 = vector.load %arg10[%c0_18, %c0_19] : memref<64x16xbf16, #tpu.memory_space<vmem>>, vector<64x16xbf16>
    %19 = arith.truncf %17 : vector<16x32xf32> to vector<16x32xbf16>
    %cst_20 = arith.constant dense<0.000000e+00> : vector<64x32xf32>
    %20 = tpu.matmul %18, %19, %cst_20 {dimension_numbers = #tpu.dot_dimension_numbers<[1], [0], [0], [1], [0, 0, 1, 1], [], []>} : vector<64x16xbf16>, vector<16x32xbf16>, vector<64x32xf32> -> vector<64x32xf32>
    %21 = arith.truncf %20 : vector<64x32xf32> to vector<64x32xbf16>
    %c1 = arith.constant 1 : index
    %c0_21 = arith.constant 0 : index
    %c0_22 = arith.constant 0 : index
    %22 = vector.load %arg12[%c1, %c0_21, %c0_22] : memref<3x32x96xbf16, #tpu.memory_space<vmem>>, vector<1x32x96xbf16>
    %23 = vector.shape_cast %22 : vector<1x32x96xbf16> to vector<32x96xbf16>
    %cst_23 = arith.constant dense<0.000000e+00> : vector<64x96xf32>
    %24 = tpu.matmul %21, %23, %cst_23 {dimension_numbers = #tpu.dot_dimension_numbers<[1], [0], [0], [1], [0, 0, 1, 1], [], []>} : vector<64x32xbf16>, vector<32x96xbf16>, vector<64x96xf32> -> vector<64x96xf32>
    %25 = arith.addf %10, %24 : vector<64x96xf32>
    %c0_24 = arith.constant 0 : index
    %c0_25 = arith.constant 0 : index
    %c0_26 = arith.constant 0 : index
    %26 = vector.load %arg3[%c0_24, %c0_25, %c0_26] : memref<1x4x256xbf16, #tpu.memory_space<vmem>>, vector<1x4x256xbf16>
    %27 = vector.shape_cast %26 : vector<1x4x256xbf16> to vector<4x256xbf16>
    %c0_27 = arith.constant 0 : index
    %c0_28 = arith.constant 0 : index
    %28 = vector.load %arg6[%c0_27, %c0_28] : memref<256x32xbf16, #tpu.memory_space<vmem>>, vector<256x32xbf16>
    %cst_29 = arith.constant dense<0.000000e+00> : vector<4x32xf32>
    %29 = tpu.matmul %27, %28, %cst_29 {dimension_numbers = #tpu.dot_dimension_numbers<[1], [0], [0], [1], [0, 0, 1, 1], [], []>} : vector<4x256xbf16>, vector<256x32xbf16>, vector<4x32xf32> -> vector<4x32xf32>
    %c0_30 = arith.constant 0 : index
    %c0_31 = arith.constant 0 : index
    %30 = vector.load %arg9[%c0_30, %c0_31] : memref<1x32xf32, #tpu.memory_space<vmem>>, vector<1x32xf32>
    %31 = vector.broadcast %30 : vector<1x32xf32> to vector<4x32xf32>
    %32 = arith.addf %29, %31 : vector<4x32xf32>
    %c0_32 = arith.constant 0 : index
    %c0_33 = arith.constant 0 : index
    %33 = vector.load %arg11[%c0_32, %c0_33] : memref<64x4xbf16, #tpu.memory_space<vmem>>, vector<64x4xbf16>
    %34 = arith.truncf %32 : vector<4x32xf32> to vector<4x32xbf16>
    %cst_34 = arith.constant dense<0.000000e+00> : vector<64x32xf32>
    %35 = tpu.matmul %33, %34, %cst_34 {dimension_numbers = #tpu.dot_dimension_numbers<[1], [0], [0], [1], [0, 0, 1, 1], [], []>} : vector<64x4xbf16>, vector<4x32xbf16>, vector<64x32xf32> -> vector<64x32xf32>
    %36 = arith.truncf %35 : vector<64x32xf32> to vector<64x32xbf16>
    %c2 = arith.constant 2 : index
    %c0_35 = arith.constant 0 : index
    %c0_36 = arith.constant 0 : index
    %37 = vector.load %arg12[%c2, %c0_35, %c0_36] : memref<3x32x96xbf16, #tpu.memory_space<vmem>>, vector<1x32x96xbf16>
    %38 = vector.shape_cast %37 : vector<1x32x96xbf16> to vector<32x96xbf16>
    %cst_37 = arith.constant dense<0.000000e+00> : vector<64x96xf32>
    %39 = tpu.matmul %36, %38, %cst_37 {dimension_numbers = #tpu.dot_dimension_numbers<[1], [0], [0], [1], [0, 0, 1, 1], [], []>} : vector<64x32xbf16>, vector<32x96xbf16>, vector<64x96xf32> -> vector<64x96xf32>
    %40 = arith.addf %25, %39 : vector<64x96xf32>
    %c0_38 = arith.constant 0 : index
    %c0_39 = arith.constant 0 : index
    %41 = vector.load %arg13[%c0_38, %c0_39] : memref<1x96xf32, #tpu.memory_space<vmem>>, vector<1x96xf32>
    %42 = vector.broadcast %41 : vector<1x96xf32> to vector<64x96xf32>
    %43 = arith.addf %40, %42 : vector<64x96xf32>
    %c0_40 = arith.constant 0 : index
    %c0_41 = arith.constant 0 : index
    %c0_42 = arith.constant 0 : index
    %44 = vector.load %arg14[%c0_40, %c0_41, %c0_42] : memref<1x64x96xf32, #tpu.memory_space<vmem>>, vector<1x64x96xf32>
    %45 = vector.shape_cast %44 : vector<1x64x96xf32> to vector<64x96xf32>
    %46 = vector.shape_cast %43 : vector<64x96xf32> to vector<1x64x96xf32>
    tpu.vector_store %arg14[%c0_40, %c0_41, %c0_42], %46 {strides = array<i32>} : memref<1x64x96xf32, #tpu.memory_space<vmem>>, vector<1x64x96xf32>,
    return
  }
  func.func @transform_0(%arg0: i32) -> (i32, i32, i32) {
    %c0_i32 = arith.constant 0 : i32
    %c0_i32_0 = arith.constant 0 : i32
    %c0_i32_1 = arith.constant 0 : i32
    return %arg0, %c0_i32, %c0_i32_0 : i32, i32, i32
  }
  func.func @transform_1(%arg0: i32) -> (i32, i32, i32) {
    %c0_i32 = arith.constant 0 : i32
    %c0_i32_0 = arith.constant 0 : i32
    %c0_i32_1 = arith.constant 0 : i32
    return %arg0, %c0_i32, %c0_i32_0 : i32, i32, i32
  }
  func.func @transform_2(%arg0: i32) -> (i32, i32, i32) {
    %c0_i32 = arith.constant 0 : i32
    %c0_i32_0 = arith.constant 0 : i32
    %c0_i32_1 = arith.constant 0 : i32
    return %arg0, %c0_i32, %c0_i32_0 : i32, i32, i32
  }
  func.func @transform_3(%arg0: i32) -> (i32, i32) {
    %c0_i32 = arith.constant 0 : i32
    %c0_i32_0 = arith.constant 0 : i32
    %c0_i32_1 = arith.constant 0 : i32
    return %c0_i32, %c0_i32_0 : i32, i32
  }
  func.func @transform_4(%arg0: i32) -> (i32, i32) {
    %c0_i32 = arith.constant 0 : i32
    %c0_i32_0 = arith.constant 0 : i32
    %c0_i32_1 = arith.constant 0 : i32
    return %c0_i32, %c0_i32_0 : i32, i32
  }
  func.func @transform_5(%arg0: i32) -> (i32, i32) {
    %c0_i32 = arith.constant 0 : i32
    %c0_i32_0 = arith.constant 0 : i32
    %c0_i32_1 = arith.constant 0 : i32
    return %c0_i32, %c0_i32_0 : i32, i32
  }
  func.func @transform_6(%arg0: i32) -> (i32, i32) {
    %c0_i32 = arith.constant 0 : i32
    %c0_i32_0 = arith.constant 0 : i32
    %c0_i32_1 = arith.constant 0 : i32
    return %c0_i32, %c0_i32_0 : i32, i32
  }
  func.func @transform_7(%arg0: i32) -> (i32, i32) {
    %c0_i32 = arith.constant 0 : i32
    %c0_i32_0 = arith.constant 0 : i32
    %c0_i32_1 = arith.constant 0 : i32
    return %c0_i32, %c0_i32_0 : i32, i32
  }
  func.func @transform_8(%arg0: i32) -> (i32, i32) {
    %c0_i32 = arith.constant 0 : i32
    %c0_i32_0 = arith.constant 0 : i32
    %c0_i32_1 = arith.constant 0 : i32
    return %c0_i32, %c0_i32_0 : i32, i32
  }
  func.func @transform_9(%arg0: i32) -> (i32, i32) {
    %c0_i32 = arith.constant 0 : i32
    %c0_i32_0 = arith.constant 0 : i32
    %c0_i32_1 = arith.constant 0 : i32
    return %c0_i32, %c0_i32_0 : i32, i32
  }
  func.func @transform_10(%arg0: i32) -> (i32, i32) {
    %c0_i32 = arith.constant 0 : i32
    %c0_i32_0 = arith.constant 0 : i32
    %c0_i32_1 = arith.constant 0 : i32
    return %c0_i32, %c0_i32_0 : i32, i32
  }
  func.func @transform_11(%arg0: i32) -> (i32, i32, i32) {
    %c0_i32 = arith.constant 0 : i32
    %c0_i32_0 = arith.constant 0 : i32
    %c0_i32_1 = arith.constant 0 : i32
    %c0_i32_2 = arith.constant 0 : i32
    return %c0_i32, %c0_i32_0, %c0_i32_1 : i32, i32, i32
  }
  func.func @transform_12(%arg0: i32) -> (i32, i32) {
    %c0_i32 = arith.constant 0 : i32
    %c0_i32_0 = arith.constant 0 : i32
    %c0_i32_1 = arith.constant 0 : i32
    return %c0_i32, %c0_i32_0 : i32, i32
  }
  func.func @transform_13(%arg0: i32) -> (i32, i32, i32) {
    %c0_i32 = arith.constant 0 : i32
    %c0_i32_0 = arith.constant 0 : i32
    %c0_i32_1 = arith.constant 0 : i32
    return %arg0, %c0_i32, %c0_i32_0 : i32, i32, i32
  }
}

module attributes {stable_mosaic.version = 11 : i64} {
  func.func @kernel(%arg0: i32, %arg1: memref<1x64x16xbf16, #tpu.memory_space<vmem>>, %arg2: memref<1x16x64xbf16, #tpu.memory_space<vmem>>, %arg3: memref<1x4x256xbf16, #tpu.memory_space<vmem>>, %arg4: memref<16x32xbf16, #tpu.memory_space<vmem>>, %arg5: memref<64x32xbf16, #tpu.memory_space<vmem>>, %arg6: memref<256x32xbf16, #tpu.memory_space<vmem>>, %arg7: memref<1x32xf32, #tpu.memory_space<vmem>>, %arg8: memref<1x32xf32, #tpu.memory_space<vmem>>, %arg9: memref<1x32xf32, #tpu.memory_space<vmem>>, %arg10: memref<64x16xbf16, #tpu.memory_space<vmem>>, %arg11: memref<64x4xbf16, #tpu.memory_space<vmem>>, %arg12: memref<3x32x96xbf16, #tpu.memory_space<vmem>>, %arg13: memref<1x96xf32, #tpu.memory_space<vmem>>, %arg14: memref<1x64x96xf32, #tpu.memory_space<vmem>>) attributes {dimension_semantics = [#tpu.dimension_semantics<parallel>], iteration_bounds = array<i64: 2>, scalar_prefetch = 0 : i64, scratch_operands = 0 : i64, tpu.core_type = #tpu.core_type<tc>, window_params = [{transform_indices = @transform_0, window_bounds = array<i64: 1, 64, 16>}, {transform_indices = @transform_1, window_bounds = array<i64: 1, 16, 64>}, {transform_indices = @transform_2, window_bounds = array<i64: 1, 4, 256>}, {pipeline_mode = #tpu.pipeline_mode<synchronous>, transform_indices = @transform_3, window_bounds = array<i64: 16, 32>}, {pipeline_mode = #tpu.pipeline_mode<synchronous>, transform_indices = @transform_4, window_bounds = array<i64: 64, 32>}, {pipeline_mode = #tpu.pipeline_mode<synchronous>, transform_indices = @transform_5, window_bounds = array<i64: 256, 32>}, {pipeline_mode = #tpu.pipeline_mode<synchronous>, transform_indices = @transform_6, window_bounds = array<i64: 1, 32>}, {pipeline_mode = #tpu.pipeline_mode<synchronous>, transform_indices = @transform_7, window_bounds = array<i64: 1, 32>}, {pipeline_mode = #tpu.pipeline_mode<synchronous>, transform_indices = @transform_8, window_bounds = array<i64: 1, 32>}, {pipeline_mode = #tpu.pipeline_mode<synchronous>, transform_indices = @transform_9, window_bounds = array<i64: 64, 16>}, {pipeline_mode = #tpu.pipeline_mode<synchronous>, transform_indices = @transform_10, window_bounds = array<i64: 64, 4>}, {pipeline_mode = #tpu.pipeline_mode<synchronous>, transform_indices = @transform_11, window_bounds = array<i64: 3, 32, 96>}, {pipeline_mode = #tpu.pipeline_mode<synchronous>, transform_indices = @transform_12, window_bounds = array<i64: 1, 96>}, {transform_indices = @transform_13, window_bounds = array<i64: 1, 64, 96>}]} {
    %c0 = arith.constant 0 : index
    %c0_0 = arith.constant 0 : index
    %c0_1 = arith.constant 0 : index
    %0 = vector.load %arg1[%c0, %c0_0, %c0_1] : memref<1x64x16xbf16, #tpu.memory_space<vmem>>, vector<1x64x16xbf16>
    %1 = vector.shape_cast %0 : vector<1x64x16xbf16> to vector<64x16xbf16>
    %c0_2 = arith.constant 0 : index
    %c0_3 = arith.constant 0 : index
    %2 = vector.load %arg4[%c0_2, %c0_3] : memref<16x32xbf16, #tpu.memory_space<vmem>>, vector<16x32xbf16>
    %cst = arith.constant dense<0.000000e+00> : vector<64x32xf32>
    %3 = tpu.matmul %1, %2, %cst {dimension_numbers = #tpu.dot_dimension_numbers<[1], [0], [0], [1], [0, 0, 1, 1], [], []>} : vector<64x16xbf16>, vector<16x32xbf16>, vector<64x32xf32> -> vector<64x32xf32>
    %c0_4 = arith.constant 0 : index
    %c0_5 = arith.constant 0 : index
    %4 = vector.load %arg7[%c0_4, %c0_5] : memref<1x32xf32, #tpu.memory_space<vmem>>, vector<1x32xf32>
    %5 = vector.broadcast %4 : vector<1x32xf32> to vector<64x32xf32>
    %6 = arith.addf %3, %5 : vector<64x32xf32>
    %7 = arith.truncf %6 : vector<64x32xf32> to vector<64x32xbf16>
    %c0_6 = arith.constant 0 : index
    %c0_7 = arith.constant 0 : index
    %c0_8 = arith.constant 0 : index
    %8 = vector.load %arg12[%c0_6, %c0_7, %c0_8] : memref<3x32x96xbf16, #tpu.memory_space<vmem>>, vector<1x32x96xbf16>
    %9 = vector.shape_cast %8 : vector<1x32x96xbf16> to vector<32x96xbf16>
    %cst_9 = arith.constant dense<0.000000e+00> : vector<64x96xf32>
    %10 = tpu.matmul %7, %9, %cst_9 {dimension_numbers = #tpu.dot_dimension_numbers<[1], [0], [0], [1], [0, 0, 1, 1], [], []>} : vector<64x32xbf16>, vector<32x96xbf16>, vector<64x96xf32> -> vector<64x96xf32>
    %c0_10 = arith.constant 0 : index
    %c0_11 = arith.constant 0 : index
    %c0_12 = arith.constant 0 : index
    %11 = vector.load %arg2[%c0_10, %c0_11, %c0_12] : memref<1x16x64xbf16, #tpu.memory_space<vmem>>, vector<1x16x64xbf16>
    %12 = vector.shape_cast %11 : vector<1x16x64xbf16> to vector<16x64xbf16>
    %c0_13 = arith.constant 0 : index
    %c0_14 = arith.constant 0 : index
    %13 = vector.load %arg5[%c0_13, %c0_14] : memref<64x32xbf16, #tpu.memory_space<vmem>>, vector<64x32xbf16>
    %cst_15 = arith.constant dense<0.000000e+00> : vector<16x32xf32>
    %14 = tpu.matmul %12, %13, %cst_15 {dimension_numbers = #tpu.dot_dimension_numbers<[1], [0], [0], [1], [0, 0, 1, 1], [], []>} : vector<16x64xbf16>, vector<64x32xbf16>, vector<16x32xf32> -> vector<16x32xf32>
    %c0_16 = arith.constant 0 : index
    %c0_17 = arith.constant 0 : index
    %15 = vector.load %arg8[%c0_16, %c0_17] : memref<1x32xf32, #tpu.memory_space<vmem>>, vector<1x32xf32>
    %16 = vector.broadcast %15 : vector<1x32xf32> to vector<16x32xf32>
    %17 = arith.addf %14, %16 : vector<16x32xf32>
    %c0_18 = arith.constant 0 : index
    %c0_19 = arith.constant 0 : index
    %18 = vector.load %arg10[%c0_18, %c0_19] : memref<64x16xbf16, #tpu.memory_space<vmem>>, vector<64x16xbf16>
    %19 = arith.truncf %17 : vector<16x32xf32> to vector<16x32xbf16>
    %cst_20 = arith.constant dense<0.000000e+00> : vector<64x32xf32>
    %20 = tpu.matmul %18, %19, %cst_20 {dimension_numbers = #tpu.dot_dimension_numbers<[1], [0], [0], [1], [0, 0, 1, 1], [], []>} : vector<64x16xbf16>, vector<16x32xbf16>, vector<64x32xf32> -> vector<64x32xf32>
    %21 = arith.truncf %20 : vector<64x32xf32> to vector<64x32xbf16>
    %c1 = arith.constant 1 : index
    %c0_21 = arith.constant 0 : index
    %c0_22 = arith.constant 0 : index
    %22 = vector.load %arg12[%c1, %c0_21, %c0_22] : memref<3x32x96xbf16, #tpu.memory_space<vmem>>, vector<1x32x96xbf16>
    %23 = vector.shape_cast %22 : vector<1x32x96xbf16> to vector<32x96xbf16>
    %cst_23 = arith.constant dense<0.000000e+00> : vector<64x96xf32>
    %24 = tpu.matmul %21, %23, %cst_23 {dimension_numbers = #tpu.dot_dimension_numbers<[1], [0], [0], [1], [0, 0, 1, 1], [], []>} : vector<64x32xbf16>, vector<32x96xbf16>, vector<64x96xf32> -> vector<64x96xf32>
    %25 = arith.addf %10, %24 : vector<64x96xf32>
    %c0_24 = arith.constant 0 : index
    %c0_25 = arith.constant 0 : index
    %c0_26 = arith.constant 0 : index
    %26 = vector.load %arg3[%c0_24, %c0_25, %c0_26] : memref<1x4x256xbf16, #tpu.memory_space<vmem>>, vector<1x4x256xbf16>
    %27 = vector.shape_cast %26 : vector<1x4x256xbf16> to vector<4x256xbf16>
    %c0_27 = arith.constant 0 : index
    %c0_28 = arith.constant 0 : index
    %28 = vector.load %arg6[%c0_27, %c0_28] : memref<256x32xbf16, #tpu.memory_space<vmem>>, vector<256x32xbf16>
    %cst_29 = arith.constant dense<0.000000e+00> : vector<4x32xf32>
    %29 = tpu.matmul %27, %28, %cst_29 {dimension_numbers = #tpu.dot_dimension_numbers<[1], [0], [0], [1], [0, 0, 1, 1], [], []>} : vector<4x256xbf16>, vector<256x32xbf16>, vector<4x32xf32> -> vector<4x32xf32>
    %c0_30 = arith.constant 0 : index
    %c0_31 = arith.constant 0 : index
    %30 = vector.load %arg9[%c0_30, %c0_31] : memref<1x32xf32, #tpu.memory_space<vmem>>, vector<1x32xf32>
    %31 = vector.broadcast %30 : vector<1x32xf32> to vector<4x32xf32>
    %32 = arith.addf %29, %31 : vector<4x32xf32>
    %c0_32 = arith.constant 0 : index
    %c0_33 = arith.constant 0 : index
    %33 = vector.load %arg11[%c0_32, %c0_33] : memref<64x4xbf16, #tpu.memory_space<vmem>>, vector<64x4xbf16>
    %34 = arith.truncf %32 : vector<4x32xf32> to vector<4x32xbf16>
    %cst_34 = arith.constant dense<0.000000e+00> : vector<64x32xf32>
    %35 = tpu.matmul %33, %34, %cst_34 {dimension_numbers = #tpu.dot_dimension_numbers<[1], [0], [0], [1], [0, 0, 1, 1], [], []>} : vector<64x4xbf16>, vector<4x32xbf16>, vector<64x32xf32> -> vector<64x32xf32>
    %36 = arith.truncf %35 : vector<64x32xf32> to vector<64x32xbf16>
    %c2 = arith.constant 2 : index
    %c0_35 = arith.constant 0 : index
    %c0_36 = arith.constant 0 : index
    %37 = vector.load %arg12[%c2, %c0_35, %c0_36] : memref<3x32x96xbf16, #tpu.memory_space<vmem>>, vector<1x32x96xbf16>
    %38 = vector.shape_cast %37 : vector<1x32x96xbf16> to vector<32x96xbf16>
    %cst_37 = arith.constant dense<0.000000e+00> : vector<64x96xf32>
    %39 = tpu.matmul %36, %38, %cst_37 {dimension_numbers = #tpu.dot_dimension_numbers<[1], [0], [0], [1], [0, 0, 1, 1], [], []>} : vector<64x32xbf16>, vector<32x96xbf16>, vector<64x96xf32> -> vector<64x96xf32>
    %40 = arith.addf %25, %39 : vector<64x96xf32>
    %c0_38 = arith.constant 0 : index
    %c0_39 = arith.constant 0 : index
    %41 = vector.load %arg13[%c0_38, %c0_39] : memref<1x96xf32, #tpu.memory_space<vmem>>, vector<1x96xf32>
    %42 = vector.broadcast %41 : vector<1x96xf32> to vector<64x96xf32>
    %43 = arith.addf %40, %42 : vector<64x96xf32>
    %c0_40 = arith.constant 0 : index
    %c0_41 = arith.constant 0 : index
    %c0_42 = arith.constant 0 : index
    %44 = vector.load %arg14[%c0_40, %c0_41, %c0_42] : memref<1x64x96xf32, #tpu.memory_space<vmem>>, vector<1x64x96xf32>
    %45 = vector.shape_cast %44 : vector<1x64x96xf32> to vector<64x96xf32>
    %46 = vector.shape_cast %43 : vector<64x96xf32> to vector<1x64x96xf32>
    tpu.vector_store %arg14[%c0_40, %c0_41, %c0_42], %46 {strides = array<i32>} : memref<1x64x96xf32, #tpu.memory_space<vmem>>, vector<1x64x96xf32>,
    return
  }
  func.func @transform_0(%arg0: i32) -> (i32, i32, i32) {
    %c0_i32 = arith.constant 0 : i32
    %c0_i32_0 = arith.constant 0 : i32
    %c0_i32_1 = arith.constant 0 : i32
    return %arg0, %c0_i32, %c0_i32_0 : i32, i32, i32
  }
  func.func @transform_1(%arg0: i32) -> (i32, i32, i32) {
    %c0_i32 = arith.constant 0 : i32
    %c0_i32_0 = arith.constant 0 : i32
    %c0_i32_1 = arith.constant 0 : i32
    return %arg0, %c0_i32, %c0_i32_0 : i32, i32, i32
  }
  func.func @transform_2(%arg0: i32) -> (i32, i32, i32) {
    %c0_i32 = arith.constant 0 : i32
    %c0_i32_0 = arith.constant 0 : i32
    %c0_i32_1 = arith.constant 0 : i32
    return %arg0, %c0_i32, %c0_i32_0 : i32, i32, i32
  }
  func.func @transform_3(%arg0: i32) -> (i32, i32) {
    %c0_i32 = arith.constant 0 : i32
    %c0_i32_0 = arith.constant 0 : i32
    %c0_i32_1 = arith.constant 0 : i32
    return %c0_i32, %c0_i32_0 : i32, i32
  }
  func.func @transform_4(%arg0: i32) -> (i32, i32) {
    %c0_i32 = arith.constant 0 : i32
    %c0_i32_0 = arith.constant 0 : i32
    %c0_i32_1 = arith.constant 0 : i32
    return %c0_i32, %c0_i32_0 : i32, i32
  }
  func.func @transform_5(%arg0: i32) -> (i32, i32) {
    %c0_i32 = arith.constant 0 : i32
    %c0_i32_0 = arith.constant 0 : i32
    %c0_i32_1 = arith.constant 0 : i32
    return %c0_i32, %c0_i32_0 : i32, i32
  }
  func.func @transform_6(%arg0: i32) -> (i32, i32) {
    %c0_i32 = arith.constant 0 : i32
    %c0_i32_0 = arith.constant 0 : i32
    %c0_i32_1 = arith.constant 0 : i32
    return %c0_i32, %c0_i32_0 : i32, i32
  }
  func.func @transform_7(%arg0: i32) -> (i32, i32) {
    %c0_i32 = arith.constant 0 : i32
    %c0_i32_0 = arith.constant 0 : i32
    %c0_i32_1 = arith.constant 0 : i32
    return %c0_i32, %c0_i32_0 : i32, i32
  }
  func.func @transform_8(%arg0: i32) -> (i32, i32) {
    %c0_i32 = arith.constant 0 : i32
    %c0_i32_0 = arith.constant 0 : i32
    %c0_i32_1 = arith.constant 0 : i32
    return %c0_i32, %c0_i32_0 : i32, i32
  }
  func.func @transform_9(%arg0: i32) -> (i32, i32) {
    %c0_i32 = arith.constant 0 : i32
    %c0_i32_0 = arith.constant 0 : i32
    %c0_i32_1 = arith.constant 0 : i32
    return %c0_i32, %c0_i32_0 : i32, i32
  }
  func.func @transform_10(%arg0: i32) -> (i32, i32) {
    %c0_i32 = arith.constant 0 : i32
    %c0_i32_0 = arith.constant 0 : i32
    %c0_i32_1 = arith.constant 0 : i32
    return %c0_i32, %c0_i32_0 : i32, i32
  }
  func.func @transform_11(%arg0: i32) -> (i32, i32, i32) {
    %c0_i32 = arith.constant 0 : i32
    %c0_i32_0 = arith.constant 0 : i32
    %c0_i32_1 = arith.constant 0 : i32
    %c0_i32_2 = arith.constant 0 : i32
    return %c0_i32, %c0_i32_0, %c0_i32_1 : i32, i32, i32
  }
  func.func @transform_12(%arg0: i32) -> (i32, i32) {
    %c0_i32 = arith.constant 0 : i32
    %c0_i32_0 = arith.constant 0 : i32
    %c0_i32_1 = arith.constant 0 : i32
    return %c0_i32, %c0_i32_0 : i32, i32
  }
  func.func @transform_13(%arg0: i32) -> (i32, i32, i32) {
    %c0_i32 = arith.constant 0 : i32
    %c0_i32_0 = arith.constant 0 : i32
    %c0_i32_1 = arith.constant 0 : i32
    return %arg0, %c0_i32, %c0_i32_0 : i32, i32, i32
  }
}

</mosaic_0001>

<bundles_post_ra>
// kernel: _lambda_.1
= control target key start
LH: loop header
LB: loop body
LE: loop exit
PB: predicated region body
PF: predicated region fallthrough
CT: control target
= control target key end

     0   :  { %s1947_s0 = inlined_call_operand.vmem [shape: bf16[2,64,16], index: 0, kind: input, shape index: {}]   ;;  %s1948_s1 = inlined_call_operand.vmem [shape: bf16[2,16,64], index: 1, kind: input, shape index: {}]   ;;  %s1949_s2 = inlined_call_operand.vmem [shape: bf16[2,4,256], index: 2, kind: input, shape index: {}]   ;;  %s1950_s3 = inlined_call_operand.vmem [shape: bf16[16,32], index: 3, kind: input, shape index: {}]   ;;  %s1951_s4 = inlined_call_operand.vmem [shape: bf16[64,32], index: 4, kind: input, shape index: {}]   ;;  %s1952_s5 = inlined_call_operand.vmem [shape: bf16[256,32], index: 5, kind: input, shape index: {}]   ;;  %s1953_s6 = inlined_call_operand.vmem [shape: f32[1,32], index: 6, kind: input, shape index: {}]   ;;  %s1954_s7 = inlined_call_operand.vmem [shape: f32[1,32], index: 7, kind: input, shape index: {}]   ;;  %s1955_s8 = inlined_call_operand.vmem [shape: f32[1,32], index: 8, kind: input, shape index: {}]   ;;  %s1956_s9 = inlined_call_operand.vmem [shape: bf16[64,16], index: 9, kind: input, shape index: {}]   ;;  %s1957_s10 = inlined_call_operand.vmem [shape: bf16[64,4], index: 10, kind: input, shape index: {}]   ;;  %s1958_s11 = inlined_call_operand.vmem [shape: bf16[3,32,96], index: 11, kind: input, shape index: {}]   ;;  %s1959_s12 = inlined_call_operand.vmem [shape: f32[1,96], index: 12, kind: input, shape index: {}]   ;;  %s1960_s13 = inlined_call_operand.hbm [shape: f32[2,64,96], index: 13, kind: output, shape index: {}]  }
   0x1   :  { %1964 = sst [smem:[#allocation8_spill]] %s1950_s3 }
   0x2   :  { %18 = vsyncpa [#allocation3], 0 }
   0x3   :  { %20 = vsyncpa [#allocation3 + $0x1], 0  ;;  %s1687_s25 = smov 0   ;;  %s1689_s26 = smov 0  }
   0x4   :  { %s1691_s27 = smov 0   ;;  %s1693_s28 = smov 0  }
   0x5 LB: > { %1965 = sst [smem:[#allocation5_spill]] %s1609_s27  ;;  %s1708_s29 = sadd.s32 4294967295, %s1613_s28   ;;  %s1613_s28 = sphi %s1693_s28, %s1971_s28   ;;  %s1609_s27 = sphi %s1691_s27, %s1973_s27   ;;  %s1605_s26 = sphi %s1689_s26, %s1975_s26   ;;  %s1601_s25 = sphi %s1687_s25, %s1974_s25  }
   0x6   : > { %s1250_s30 = sadd.s32 4294967294, %s1613_s28   ;;  %s1712_s14 = sadd.s32 1, %s1613_s28  }
   0x7   : > { %1966 = sst [smem:[#allocation6_spill]] %s1712_s14  ;;  %s321_s15 = sadd.s32 1, %s1609_s27 }
   0x8   : > { %s318_s16 = ssub.s32 %s1613_s28, %s1712_s14  ;;  %p331_p0 = scmp.ne.s32.totalorder %s1609_s27, %s1605_s26 }
   0x9   : > { %p319_p1 = scmp.eq.s32.totalorder %s318_s16, 0  ;;  %p332_p2 = scmp.eq.s32.totalorder %s1708_s29, 1 }
   0xa   : > { %p337_p3 = scmp.ne.s32.totalorder %s1605_s26, %s1601_s25  ;;  %p338_p4 = scmp.eq.s32.totalorder %s1250_s30, 1 }
   0xb   : > { %s1723_s17 = scalar_select %p319_p1, %s1609_s27, %s321_s15  }
   0xc   : > { %p1725_p5 = por %p332_p2, %p331_p0  ;;  %p1729_p6 = por %p338_p4, %p337_p3 }
   0xd   : > { %1967 = sst [smem:[#allocation7_spill]] %s1723_s17  ;;  %p1253_p7 = scmp.ge.s32.totalorder %s1613_s28, 1 }
   0xe   : > { %p410_p8 = scmp.lt.s32.totalorder %s1613_s28, 3 }
  0x10   : > { %p411_p9 = pnand %p1253_p7, %p410_p8 }
  0x11   : > { %p464_p10 = scmp.lt.s32.totalorder (!%p411_p9), %s1708_s29, 1  ;;  %s1970_s3 = sld [smem:[#allocation8_spill]] (!%p411_p9) }
  0x12   : > { %414 = sbr.rel (%p411_p9) target bundleno = 718 (0x2ce), region = 72  ;;  %s461_s27 = sand.u32 (!%p411_p9), 1, %s1605_s26  }
  0x13   : > { %s1254_s17 = sshll.u32 (!%p411_p9), %s461_s27, 6 }
  0x17   : > { %v1473_v0 = vld [vmem:[%s1951_s4 + $0x18] sm:$0xff]  ;;  %v1466_v1 = vld [vmem:[%s1970_s3] sm:$0xff]  ;;  %v1472_v2 = vld [vmem:[%s1951_s4 + $0x10] sm:$0xff]  ;;  %s465_s15 = scalar_select %p464_p10, %s1708_s29, 1  ;;  %vm520_vm0 = vcmask 130048   ;;  %vm613_vm1 = vcmask 523264  }
  0x18   : > { %621 = vmatpush.bf16.msra.mxu1 %v1473_v0  ;;  %1503 = vmatpush.bf16.msra.mxu2 %v1466_v1  ;;  %v1471_v3 = vld [vmem:[%s1951_s4 + $0x8] sm:$0xff]  ;;  %v1470_v6 = vld [vmem:[%s1951_s4] sm:$0xff]  ;;  %v1487_v11 = vld [vmem:[%s1952_s5 + $0x38] sm:$0xff]  ;;  %vm722_vm2 = vcmask 261120   ;;  %vm1024_vm3 = vcmask 1041408   ;;  %vm1011_vm4 = vcmask 31744  }
  0x19   : > { %540 = vmatpush.bf16.msra.mxu0 %v1466_v1  ;;  %s1459_s16 = sshll.u32 %s465_s15, 5  ;;  %s1461_s23 = sshll.u32 %s465_s15, 2  ;;  %v1547_v12 = vld [vmem:[%s1954_s7] ss:$0 sm:$0xff]  ;;  %v1495_v18 = vld [vmem:[%s1952_s5 + $0x78] sm:$0xff]  ;;  %v1486_v19 = vld [vmem:[%s1952_s5 + $0x30] sm:$0xff] }
  0x1a   : > { %s1749_s20 = scalar_lea.vmem %s1947_s0, %s1459_s16  ;;  %s1460_s24 = sshll.u32 %s465_s15, 3  ;;  %v1474_v17 = vld [vmem:[%s1956_s9] sm:$0xff]  ;;  %v1494_v21 = vld [vmem:[%s1952_s5 + $0x70] sm:$0xff]  ;;  %v1485_v22 = vld [vmem:[%s1952_s5 + $0x28] sm:$0xff]  ;;  %vm1139_vm5 = vcmask 785408  }
  0x1b   : > { %v1464_v4 = vld [vmem:[%s1749_s20 + $0x10] sm:$0xff]  ;;  %s478_s14 = scalar_lea.vmem %s1949_s2, %s1461_s23  ;;  %s473_s22 = scalar_lea.vmem %s1948_s1, %s1460_s24  ;;  %v1465_v8 = vld [vmem:[%s1749_s20 + $0x18] sm:$0xff]  ;;  %v1462_v10 = vld [vmem:[%s1749_s20] sm:$0xff] }
  0x1c   : > { %622 = vmatpush.bf16.msra.mxu1 %v1472_v2  ;;  %v817_v5 = vld [vmem:[%s478_s14] sm:$0xf]  ;;  %1283 = vmatmul.msk.bf16.vlgmr.msra.gmra.mxu2 %vm520_vm0, %v1464_v4  ;;  %v1463_v20 = vld [vmem:[%s1749_s20 + $0x8] sm:$0xff]  ;;  %v1483_v26 = vld [vmem:[%s1952_s5 + $0x18] sm:$0xff]  ;;  %s1502_s3 = sshll.u32 %s1708_s29, 6  ;;  %s1149_s29 = scalar_lea.sflag [#allocation3], %s461_s27 }
  0x1d   : > { %855 = vst [vmem:[#allocation1] ss:$4 sm:$0xff] %v817_v5  ;;  %v1469_v7 = vld [vmem:[%s473_s22] sm:$0xff]  ;;  %1281 = vmatmul.msk.bf16.vlgmr.msra.gmra.mxu0 %vm520_vm0, %v1462_v10  ;;  %v1493_v23 = vld [vmem:[%s1952_s5 + $0x68] sm:$0xff]  ;;  %v1491_v28 = vld [vmem:[%s1952_s5 + $0x58] sm:$0xff]  ;;  %s1894_s22 = scalar_lea.vmem [#allocation2], %s1254_s17  ;;  %s1160_s23 = scalar_lea.hbm %s1960_s13, %s1502_s3 }
  0x1e   : > { %956 = vmatpush.bf16.msrb.mxu0 %v1487_v11  ;;  %v1484_v24 = vld [vmem:[%s1952_s5 + $0x20] sm:$0xff]  ;;  %v1475_v27 = vld [vmem:[%s1956_s9 + $0x8] sm:$0xff]  ;;  %v1482_v29 = vld [vmem:[%s1952_s5 + $0x10] sm:$0xff]  ;;  %s1161_s24 = sshll.u32 %s1894_s22, 4  ;;  %s1163_s30 = sshll.u32 %s1160_s23, 4  ;;  %s1162_s24 = int_to_ptr.vmem [resolvable:$true] %s1161_s24  ;;  %s1164_s30 = int_to_ptr.hbm [resolvable:$true] %s1163_s30 }
  0x1f   : > { %v1492_v25 = vld [vmem:[%s1952_s5 + $0x60] sm:$0xff]  ;;  %v1490_v30 = vld [vmem:[%s1952_s5 + $0x50] sm:$0xff]  ;;  %v1481_v31 = vld [vmem:[%s1952_s5 + $0x8] sm:$0xff]  ;;  %s1565_s20 = sshra.s32 %s1164_s30, 4  ;;  %s1571_s3 = scalar_lea.hbm %s1960_s13, 128  ;;  %s1566_s20 = int_to_ptr.hbm [resolvable:$true] %s1565_s20 }
  0x20   : > { %623 = vmatpush.bf16.msra.mxu1 %v1471_v3  ;;  %v1489_v32 = vld [vmem:[%s1952_s5 + $0x48] sm:$0xff]  ;;  %v1480_v33 = vld [vmem:[%s1952_s5] sm:$0xff]  ;;  %v1476_v36 = vld [vmem:[%s1956_s9 + $0x10] sm:$0xff]  ;;  %s1567_s17 = scalar_lea.hbm %s1566_s20, 64  ;;  %p1572_p0 = scmp.lt.s32.totalorder %s1566_s20, %s1960_s13 }
  0x21   : > { %v1488_v34 = vld [vmem:[%s1952_s5 + $0x40] sm:$0xff]  ;;  %v1477_v43 = vld [vmem:[%s1956_s9 + $0x18] sm:$0xff]  ;;  %v1478_v46 = vld [vmem:[%s1958_s11 + $0x10] sm:$0xff]  ;;  %p1568_p11 = scmp.ne.s32.totalorder %s1566_s20, %s1567_s17  ;;  %p1573_p1 = scmp.lt.s32.totalorder %s1571_s3, %s1567_s17 }
  0x22   : > { %957 = vmatpush.bf16.msrb.mxu0 %v1486_v19  ;;  %v1548_v38 = vld [vmem:[%s1953_s6] ss:$0 sm:$0xff]  ;;  %v1479_v45 = vld [vmem:[%s1958_s11 + $0x18] sm:$0xff]  ;;  %v1468_v48 = vld [vmem:[%s1958_s11 + $0x8] sm:$0xff] }
  0x23   : > { %1504 = vmatpush.bf16.msra.mxu3 %v1479_v45  ;;  %v1467_v50 = vld [vmem:[%s1958_s11] sm:$0xff]  ;;  %p1569_p12 = pnand %p1568_p11, %p1725_p5  ;;  %p1574_p2 = por %p1573_p1, %p1572_p0 }
  0x24   : > { %624 = vmatpush.bf16.msra.mxu1 %v1470_v6  ;;  %v856_v35 = vld.sshfl [vmem:[#allocation1] sm:$0xff pattern:$0x73625140]  ;;  %v857_v44 = vld.sshfl [vmem:[#allocation1 + $0x8] sm:$0xff pattern:$0x73625140] }
  0x25   : > { %v1549_v10 = vld [vmem:[%s1955_s8] ss:$0 sm:$0xff]  ;;  %p1570_p13 = pneg %p1569_p12 }
  0x26   : > { %958 = vmatpush.bf16.msrb.mxu0 %v1485_v22  ;;  %v1496_v19 = vld [vmem:[%s1957_s10] sm:$0xff]  ;;  %v1497_v22 = vld [vmem:[%s1957_s10 + $0x8] sm:$0xff] }
  0x27   : > { %1305 = vmatmul.msk.bf16.vlgmr.msra.gmra.mxu1 %vm613_vm1, %v1469_v7  ;;  %1505 = vmatpush.bf16.msra.mxu3 %v1478_v46  ;;  %p1575_p3 = pnand %p1574_p2, %p1570_p13 }
  0x28   : > { %741 = vmatpush.bf16.msrb.mxu1 %v1479_v45 }
  0x2a   : > { %959 = vmatpush.bf16.msrb.mxu0 %v1484_v24  ;;  %v1499_v24 = vld [vmem:[%s1957_s10 + $0x18] sm:$0xff] }
  0x2c   : > { %1284 = vmatmul.msk.bf16.gmra.mxu2 %vm520_vm0, %v1465_v8  ;;  %742 = vmatpush.bf16.msrb.mxu1 %v1478_v46 }
  0x2d   : > { %1282 = vmatmul.msk.bf16.gmra.mxu0 %vm520_vm0, %v1463_v20 }
  0x2e   : > { %960 = vmatpush.bf16.msrb.mxu0 %v1483_v26 }
  0x30   : > { %794 = vmatpush.bf16.msra.mxu1 %v1468_v48 }
  0x32   : > { %961 = vmatpush.bf16.msrb.mxu0 %v1482_v29  ;;  %v1500_v29 = vld [vmem:[%s1958_s11 + $0x20] sm:$0xff] }
  0x34   : > { %795 = vmatpush.bf16.msra.mxu1 %v1467_v50  ;;  %v1550_v50 = vld [vmem:[%s1959_s12] ss:$0 sm:$0xff] }
  0x36   : > { %962 = vmatpush.bf16.msrb.mxu0 %v1481_v31 }
  0x3a   : > { %963 = vmatpush.bf16.msrb.mxu0 %v1480_v33 }
  0x3d   : > { %964 = vmatmul.bf16.vlgmr.msrb.gmra.mxu0 %v856_v35 }
  0x9a   : > { %v542_v49 = vpop.f32.mrf.mxu0 }
  0x9b   : > { %v543_v59 = vadd.f32 %v1548_v38, %v542_v49 }
  0x9f   : > { %v552_v37 = vpop.f32.mrf.mxu2 }
  0xa0   : > { %v553_v39 = vadd.f32 %v1548_v38, %v552_v37 }
  0xa2   : > { %v544_v52 = vpop.f32.mrf.mxu0 }
  0xa3   : > { %v545_v60 = vadd.f32 %v1548_v38, %v544_v52 }
  0xa4   : > { %v626_v9 = vpop.f32.mrf.mxu1 }
  0xa5   : > { %v627_v14 = vadd.f32 %v1547_v12, %v626_v9  ;;  %v562_v61 = vpack.c.bf16 %v545_v60, %v543_v59 }
  0xa7   : > { %v554_v40 = vpop.f32.mrf.mxu2 }
  0xa8   : > { %v555_v41 = vadd.f32 %v1548_v38, %v554_v40 }
  0xaa   : > { %v564_v42 = vpack.c.bf16 %v555_v41, %v553_v39  ;;  %v547_v54 = vpop.f32.mrf.mxu0 }
  0xab   : > { %v548_v3 = vadd.f32 %v1548_v38, %v547_v54 }
  0xac   : > { %v628_v13 = vpop.f32.mrf.mxu1 }
  0xad   : > { %v629_v15 = vadd.f32 %v1547_v12, %v628_v13 }
  0xaf   : > { %v639_v16 = vpack.c.bf16 %v629_v15, %v627_v14  ;;  %v557_v47 = vpop.f32.mrf.mxu2 }
  0xb1   : > { %679 = vmatpush.bf16.msrb.mxu2 %v639_v16  ;;  %v558_v16 = vadd.f32 %v1548_v38, %v557_v47 }
  0xb2   : > { %v549_v57 = vpop.f32.mrf.mxu0 }
  0xb3   : > { %v550_v4 = vadd.f32 %v1548_v38, %v549_v57 }
  0xb4   : > { %1322 = vmatmul.msk.bf16.vlgmr.msrb.gmra.mxu2 %vm520_vm0, %v1474_v17 }
  0xb5   : > { %969 = vmatpush.bf16.msra.mxu2 %v1495_v18  ;;  %v563_v5 = vpack.c.bf16 %v550_v4, %v548_v3 }
  0xb7   : > { %v559_v51 = vpop.f32.mrf.mxu2 }
  0xb8   : > { %v560_v17 = vadd.f32 %v1548_v38, %v559_v51 }
  0xb9   : > { %970 = vmatpush.bf16.msra.mxu2 %v1494_v21 }
  0xba   : > { %v965_v62 = vpop.f32.mrf.mxu0  ;;  %v565_v21 = vpack.c.bf16 %v560_v17, %v558_v16 }
  0xbb   : > { %v966_v12 = vadd.f32 %v1549_v10, %v965_v62 }
  0xbd   : > { %971 = vmatpush.bf16.msra.mxu2 %v1493_v23  ;;  %v1498_v23 = vld [vmem:[%s1957_s10 + $0x10] sm:$0xff] }
  0xc1   : > { %972 = vmatpush.bf16.msra.mxu2 %v1492_v25 }
  0xc2   : > { %v967_v1 = vpop.f32.mrf.mxu0 }
  0xc4   : > { %1323 = vmatmul.msk.bf16.gmra.mxu2 %vm520_vm0, %v1475_v27 }
  0xc5   : > { %973 = vmatpush.bf16.msra.mxu2 %v1491_v28  ;;  %v1501_v28 = vld [vmem:[%s1958_s11 + $0x28] sm:$0xff] }
  0xc6   : > { %1096 = vmatpush.bf16.msra.mxu0 %v1501_v28 }
  0xc9   : > { %974 = vmatpush.bf16.msra.mxu2 %v1490_v30 }
  0xca   : > { %1097 = vmatpush.bf16.msra.mxu0 %v1500_v29 }
  0xcd   : > { %975 = vmatpush.bf16.msra.mxu2 %v1489_v32 }
  0xd1   : > { %976 = vmatpush.bf16.msra.mxu2 %v1488_v34 }
  0xd4   : > { %1324 = vmatmul.msk.bf16.gmra.mxu2 %vm520_vm0, %v1476_v36 }
  0xe4   : > { %1325 = vmatmul.msk.bf16.gmra.mxu2 %vm520_vm0, %v1477_v43 }
  0xf4   : > { %977 = vmatmul.bf16.vlgmr.msra.gmra.mxu2 %v857_v44 }
 0x137   : > { %v681_v53 = vpop.f32.mrf.mxu2 }
 0x13f   : > { %v683_v55 = vpop.f32.mrf.mxu2 }
 0x140   : > { %v701_v56 = vpack.c.bf16 %v683_v55, %v681_v53 }
 0x142   : > { %1338 = vmatmul.msk.bf16.vlgmr.msrb.gmra.mxu1 %vm722_vm2, %v701_v56 }
 0x147   : > { %v686_v58 = vpop.f32.mrf.mxu2 }
 0x14f   : > { %v688_v63 = vpop.f32.mrf.mxu2 }
 0x150   : > { %v702_v0 = vpack.c.bf16 %v688_v63, %v686_v58 }
 0x152   : > { %1339 = vmatmul.msk.bf16.vlgmr.msra.gmra.mxu3 %vm722_vm2, %v702_v0  ;;  %1350 = vmatmul.msk.bf16.vlgmr.msra.gmra.mxu1 %vm722_vm2, %v562_v61 }
 0x157   : > { %v691_v2 = vpop.f32.mrf.mxu2 }
 0x15f   : > { %v693_v6 = vpop.f32.mrf.mxu2 }
 0x160   : > { %v703_v7 = vpack.c.bf16 %v693_v6, %v691_v2 }
 0x162   : > { %1340 = vmatmul.msk.bf16.gmra.mxu3 %vm722_vm2, %v703_v7  ;;  %1351 = vmatmul.msk.bf16.gmra.mxu1 %vm722_vm2, %v563_v5 }
 0x167   : > { %v696_v8 = vpop.f32.mrf.mxu2 }
 0x16f   : > { %v698_v9 = vpop.f32.mrf.mxu2 }
 0x170   : > { %v704_v11 = vpack.c.bf16 %v698_v9, %v696_v8 }
 0x172   : > { %1341 = vmatmul.msk.bf16.gmra.mxu3 %vm722_vm2, %v704_v11  ;;  %1352 = vmatmul.msk.bf16.gmra.mxu1 %vm722_vm2, %v564_v42 }
 0x177   : > { %v978_v13 = vpop.f32.mrf.mxu2 }
 0x178   : > { %v979_v14 = vadd.f32 %v978_v13, %v966_v12 }
 0x17a   : > { %v990_v15 = vpack.c.bf16 %v979_v14, %v979_v14 }
 0x17c   : > { %v1026_v18 = vsel %vm1024_vm3, %v990_v15, 0 }
 0x17d   : > { %1035 = vmatpush.bf16.msrb.mxu3 %v1026_v18 }
 0x17f   : > { %v980_v20 = vpop.f32.mrf.mxu2 }
 0x182   : > { %1353 = vmatmul.msk.bf16.gmra.mxu1 %vm722_vm2, %v565_v21  ;;  %1434 = vmatmul.msk.bf16.vlgmr.msrb.gmra.mxu3 %vm1011_vm4, %v1496_v19 }
 0x192   : > { %1435 = vmatmul.msk.bf16.gmra.mxu3 %vm1011_vm4, %v1497_v22 }
 0x1a2   : > { %1436 = vmatmul.msk.bf16.gmra.mxu3 %vm1011_vm4, %v1498_v23 }
 0x1b2   : > { %1437 = vmatmul.msk.bf16.gmra.mxu3 %vm1011_vm4, %v1499_v24 }
 0x1bf   : > { %v744_v45 = vpop.f32.mrf.mxu1 }
 0x1c7   : > { %v746_v46 = vpop.f32.mrf.mxu1 }
 0x1cf   : > { %v797_v47 = vpop.f32.mrf.mxu1 }
 0x1d0   : > { %v798_v49 = vadd.f32 %v797_v47, %v744_v45 }
 0x1d5   : > { %v749_v25 = vpop.f32.mrf.mxu3 }
 0x1d7   : > { %v799_v48 = vpop.f32.mrf.mxu1 }
 0x1d8   : > { %v800_v55 = vadd.f32 %v799_v48, %v746_v46 }
 0x1dd   : > { %v751_v26 = vpop.f32.mrf.mxu3 }
 0x1df   : > { %v802_v53 = vpop.f32.mrf.mxu1 }
 0x1e0   : > { %v803_v60 = vadd.f32 %v802_v53, %v749_v25 }
 0x1e5   : > { %v754_v27 = vpop.f32.mrf.mxu3 }
 0x1e7   : > { %v804_v59 = vpop.f32.mrf.mxu1 }
 0x1e8   : > { %v805_v1 = vadd.f32 %v804_v59, %v751_v26 }
 0x1ed   : > { %v756_v30 = vpop.f32.mrf.mxu3 }
 0x1ef   : > { %v807_v0 = vpop.f32.mrf.mxu1 }
 0x1f0   : > { %v808_v5 = vadd.f32 %v807_v0, %v754_v27 }
 0x1f5   : > { %v759_v31 = vpop.f32.mrf.mxu3 }
 0x1f7   : > { %v809_v6 = vpop.f32.mrf.mxu1 }
 0x1f8   : > { %v810_v10 = vadd.f32 %v809_v6, %v756_v30 }
 0x1fd   : > { %v1882_v32 = vpop.f32.mrf.mxu3 }
 0x1ff   : > { %v812_v13 = vpop.f32.mrf.mxu1 }
 0x200   : > { %v813_v15 = vadd.f32 %v812_v13, %v759_v31 }
 0x205   : > { %v1037_v33 = vpop.f32.mrf.mxu3 }
 0x207   : > { %v814_v19 = vpop.f32.mrf.mxu1 }
 0x208   : > { %v815_v20 = vadd.f32 %v814_v19, %v1882_v32 }
 0x20d   : > { %v1039_v34 = vpop.f32.mrf.mxu3 }
 0x20e   : > { %v1057_v35 = vpack.c.bf16 %v1039_v34, %v1037_v33 }
 0x210   : > { %1450 = vmatmul.msk.bf16.vlgmr.msra.gmra.mxu0 %vm722_vm2, %v1057_v35 }
 0x215   : > { %v1042_v36 = vpop.f32.mrf.mxu3 }
 0x21d   : > { %v1044_v37 = vpop.f32.mrf.mxu3 }
 0x21e   : > { %v1058_v38 = vpack.c.bf16 %v1044_v37, %v1042_v36 }
 0x220   : > { %1451 = vmatmul.msk.bf16.gmra.mxu0 %vm722_vm2, %v1058_v38 }
 0x225   : > { %v1047_v39 = vpop.f32.mrf.mxu3 }
 0x22d   : > { %v1049_v40 = vpop.f32.mrf.mxu3 }
 0x22e   : > { %v1059_v41 = vpack.c.bf16 %v1049_v40, %v1047_v39 }
 0x230   : > { %1452 = vmatmul.msk.bf16.gmra.mxu0 %vm722_vm2, %v1059_v41 }
 0x235   : > { %v1052_v42 = vpop.f32.mrf.mxu3 }
 0x23d   : > { %v1054_v43 = vpop.f32.mrf.mxu3 }
 0x23e   : > { %v1060_v44 = vpack.c.bf16 %v1054_v43, %v1052_v42 }
 0x240   : > { %1453 = vmatmul.msk.bf16.gmra.mxu0 %vm722_vm2, %v1060_v44 }
 0x28d   : > { %v1099_v51 = vpop.f32.mrf.mxu0 }
 0x28e   : > { %v1119_v52 = vadd.f32 %v1099_v51, %v798_v49 }
 0x290   : > { %v1131_v54 = vadd.f32 %v1550_v50, %v1119_v52 }
 0x292   : > { %1140 = vst.msk [vmem:[%s1894_s22] sm:$0xff] %vm1139_vm5, %v1131_v54 }
 0x295   : > { %v1101_v56 = vpop.f32.mrf.mxu0 }
 0x296   : > { %v1120_v57 = vadd.f32 %v1101_v56, %v800_v55 }
 0x298   : > { %v1132_v58 = vadd.f32 %v1550_v50, %v1120_v57 }
 0x29a   : > { %1141 = vst.msk [vmem:[%s1894_s22 + $0x8] sm:$0xff] %vm1139_vm5, %v1132_v58 }
 0x29d   : > { %v1104_v61 = vpop.f32.mrf.mxu0 }
 0x29e   : > { %v1121_v62 = vadd.f32 %v1104_v61, %v803_v60 }
 0x2a0   : > { %v1133_v63 = vadd.f32 %v1550_v50, %v1121_v62 }
 0x2a2   : > { %1142 = vst.msk [vmem:[%s1894_s22 + $0x10] sm:$0xff] %vm1139_vm5, %v1133_v63 }
 0x2a5   : > { %v1106_v2 = vpop.f32.mrf.mxu0 }
 0x2a6   : > { %v1122_v3 = vadd.f32 %v1106_v2, %v805_v1 }
 0x2a8   : > { %v1134_v4 = vadd.f32 %v1550_v50, %v1122_v3 }
 0x2aa   : > { %1143 = vst.msk [vmem:[%s1894_s22 + $0x18] sm:$0xff] %vm1139_vm5, %v1134_v4 }
 0x2ad   : > { %v1109_v7 = vpop.f32.mrf.mxu0 }
 0x2ae   : > { %v1123_v8 = vadd.f32 %v1109_v7, %v808_v5 }
 0x2b0   : > { %v1135_v9 = vadd.f32 %v1550_v50, %v1123_v8 }
 0x2b2   : > { %1144 = vst.msk [vmem:[%s1894_s22 + $0x20] sm:$0xff] %vm1139_vm5, %v1135_v9 }
 0x2b5   : > { %v1111_v11 = vpop.f32.mrf.mxu0 }
 0x2b6   : > { %v1124_v12 = vadd.f32 %v1111_v11, %v810_v10 }
 0x2b8   : > { %v1136_v14 = vadd.f32 %v1550_v50, %v1124_v12 }
 0x2ba   : > { %1145 = vst.msk [vmem:[%s1894_s22 + $0x28] sm:$0xff] %vm1139_vm5, %v1136_v14 }
 0x2bd   : > { %v1114_v16 = vpop.f32.mrf.mxu0 }
 0x2be   : > { %v1125_v17 = vadd.f32 %v1114_v16, %v813_v15 }
 0x2c0   : > { %v1137_v18 = vadd.f32 %v1550_v50, %v1125_v17 }
 0x2c2   : > { %1146 = vst.msk [vmem:[%s1894_s22 + $0x30] sm:$0xff] %vm1139_vm5, %v1137_v18 }
 0x2c5   : > { %v1116_v21 = vpop.f32.mrf.mxu0 }
 0x2c6   : > { %v1126_v22 = vadd.f32 %v1116_v21, %v815_v20 }
 0x2c8   : > { %v1138_v23 = vadd.f32 %v1550_v50, %v1126_v22 }
 0x2ca   : > { %1147 = vst.msk [vmem:[%s1894_s22 + $0x38] sm:$0xff] %vm1139_vm5, %v1138_v23 }
 0x2cb   : > { %1578 = shalt.err (!%p1575_p3)
}
 0x2cc   : > { %s1615_s27 = smov 128   ;;  %s1616_s22 = smov 8  }
 0x2cd   : > { %1506 = dma.vmem_to_hbm [thread:$0]  (%p1725_p5), %s1162_s24, 1024, %s1164_s30, %s1149_s29, %s1615_s27, %s1615_s27, %s1616_s22  }
 0x2ce PF: > { %p1512_p4 = scmp.ge.s32.totalorder %s1613_s28, 2  ;;  %s1178_s23 = sand.u32 1, %s1601_s25  }
 0x2cf   : > { %s1179_s16 = scalar_lea.sflag [#allocation3], %s1178_s23 }
 0x2d0   : > { %p1509_p7 = pnand %p1512_p4, %p1729_p6 }
 0x2d2   : > { %p1510_p8 = pneg %p1509_p7 }
 0x2d4   : > { %1596 = dma.done.wait (%p1510_p8), %s1179_s16, 1024  }
 0x2d5   : > { %1598 = vsyncadd (%p1510_p8), %s1179_s16, 4294966272  ;;  %s1971_s28 = sld [smem:[#allocation6_spill]]  ;;  %s1974_s25 = smov %s1605_s26 }
 0x2d6   : > { %s1972_s20 = sld [smem:[#allocation5_spill]] }
 0x2d7   : > { %s1973_s27 = sld [smem:[#allocation7_spill]] }
 0x2db   : > { %p23_p9 = scmp.ge.s32.totalorder %s1971_s28, 4  }
 0x2dc   : > { %s1975_s26 = smov %s1972_s20 }
 0x2dd   :  { %25 = sbr.rel (!%p23_p9) target bundleno = 5 (0x5), region = 115 }
 0x2e2   :  { %1185 = vsyncpa [#allocation3], 1 }
 0x2e3   :  { %1187 = vsyncpa [#allocation3 + $0x1], 1 }

// kernel: _lambda_.1
= control target key start
LH: loop header
LB: loop body
LE: loop exit
PB: predicated region body
PF: predicated region fallthrough
CT: control target
= control target key end

     0   :  { %s1947_s0 = inlined_call_operand.vmem [shape: bf16[2,64,16], index: 0, kind: input, shape index: {}]   ;;  %s1948_s1 = inlined_call_operand.vmem [shape: bf16[2,16,64], index: 1, kind: input, shape index: {}]   ;;  %s1949_s2 = inlined_call_operand.vmem [shape: bf16[2,4,256], index: 2, kind: input, shape index: {}]   ;;  %s1950_s3 = inlined_call_operand.vmem [shape: bf16[16,32], index: 3, kind: input, shape index: {}]   ;;  %s1951_s4 = inlined_call_operand.vmem [shape: bf16[64,32], index: 4, kind: input, shape index: {}]   ;;  %s1952_s5 = inlined_call_operand.vmem [shape: bf16[256,32], index: 5, kind: input, shape index: {}]   ;;  %s1953_s6 = inlined_call_operand.vmem [shape: f32[1,32], index: 6, kind: input, shape index: {}]   ;;  %s1954_s7 = inlined_call_operand.vmem [shape: f32[1,32], index: 7, kind: input, shape index: {}]   ;;  %s1955_s8 = inlined_call_operand.vmem [shape: f32[1,32], index: 8, kind: input, shape index: {}]   ;;  %s1956_s9 = inlined_call_operand.vmem [shape: bf16[64,16], index: 9, kind: input, shape index: {}]   ;;  %s1957_s10 = inlined_call_operand.vmem [shape: bf16[64,4], index: 10, kind: input, shape index: {}]   ;;  %s1958_s11 = inlined_call_operand.vmem [shape: bf16[3,32,96], index: 11, kind: input, shape index: {}]   ;;  %s1959_s12 = inlined_call_operand.vmem [shape: f32[1,96], index: 12, kind: input, shape index: {}]   ;;  %s1960_s13 = inlined_call_operand.hbm [shape: f32[2,64,96], index: 13, kind: output, shape index: {}]  }
   0x1   :  { %1964 = sst [smem:[#allocation8_spill]] %s1950_s3 }
   0x2   :  { %18 = vsyncpa [#allocation3], 0 }
   0x3   :  { %20 = vsyncpa [#allocation3 + $0x1], 0  ;;  %s1687_s25 = smov 0   ;;  %s1689_s26 = smov 0  }
   0x4   :  { %s1691_s27 = smov 0   ;;  %s1693_s28 = smov 0  }
   0x5 LB: > { %1965 = sst [smem:[#allocation5_spill]] %s1609_s27  ;;  %s1708_s29 = sadd.s32 4294967295, %s1613_s28   ;;  %s1613_s28 = sphi %s1693_s28, %s1971_s28   ;;  %s1609_s27 = sphi %s1691_s27, %s1973_s27   ;;  %s1605_s26 = sphi %s1689_s26, %s1975_s26   ;;  %s1601_s25 = sphi %s1687_s25, %s1974_s25  }
   0x6   : > { %s1250_s30 = sadd.s32 4294967294, %s1613_s28   ;;  %s1712_s14 = sadd.s32 1, %s1613_s28  }
   0x7   : > { %1966 = sst [smem:[#allocation6_spill]] %s1712_s14  ;;  %s321_s15 = sadd.s32 1, %s1609_s27 }
   0x8   : > { %s318_s16 = ssub.s32 %s1613_s28, %s1712_s14  ;;  %p331_p0 = scmp.ne.s32.totalorder %s1609_s27, %s1605_s26 }
   0x9   : > { %p319_p1 = scmp.eq.s32.totalorder %s318_s16, 0  ;;  %p332_p2 = scmp.eq.s32.totalorder %s1708_s29, 1 }
   0xa   : > { %p337_p3 = scmp.ne.s32.totalorder %s1605_s26, %s1601_s25  ;;  %p338_p4 = scmp.eq.s32.totalorder %s1250_s30, 1 }
   0xb   : > { %s1723_s17 = scalar_select %p319_p1, %s1609_s27, %s321_s15  }
   0xc   : > { %p1725_p5 = por %p332_p2, %p331_p0  ;;  %p1729_p6 = por %p338_p4, %p337_p3 }
   0xd   : > { %1967 = sst [smem:[#allocation7_spill]] %s1723_s17  ;;  %p1253_p7 = scmp.ge.s32.totalorder %s1613_s28, 1 }
   0xe   : > { %p410_p8 = scmp.lt.s32.totalorder %s1613_s28, 3 }
  0x10   : > { %p411_p9 = pnand %p1253_p7, %p410_p8 }
  0x11   : > { %p464_p10 = scmp.lt.s32.totalorder (!%p411_p9), %s1708_s29, 1  ;;  %s1970_s3 = sld [smem:[#allocation8_spill]] (!%p411_p9) }
  0x12   : > { %414 = sbr.rel (%p411_p9) target bundleno = 718 (0x2ce), region = 72  ;;  %s461_s27 = sand.u32 (!%p411_p9), 1, %s1605_s26  }
  0x13   : > { %s1254_s17 = sshll.u32 (!%p411_p9), %s461_s27, 6 }
  0x17   : > { %v1473_v0 = vld [vmem:[%s1951_s4 + $0x18] sm:$0xff]  ;;  %v1466_v1 = vld [vmem:[%s1970_s3] sm:$0xff]  ;;  %v1472_v2 = vld [vmem:[%s1951_s4 + $0x10] sm:$0xff]  ;;  %s465_s15 = scalar_select %p464_p10, %s1708_s29, 1  ;;  %vm520_vm0 = vcmask 130048   ;;  %vm613_vm1 = vcmask 523264  }
  0x18   : > { %621 = vmatpush.bf16.msra.mxu1 %v1473_v0  ;;  %1503 = vmatpush.bf16.msra.mxu2 %v1466_v1  ;;  %v1471_v3 = vld [vmem:[%s1951_s4 + $0x8] sm:$0xff]  ;;  %v1470_v6 = vld [vmem:[%s1951_s4] sm:$0xff]  ;;  %v1487_v11 = vld [vmem:[%s1952_s5 + $0x38] sm:$0xff]  ;;  %vm722_vm2 = vcmask 261120   ;;  %vm1024_vm3 = vcmask 1041408   ;;  %vm1011_vm4 = vcmask 31744  }
  0x19   : > { %540 = vmatpush.bf16.msra.mxu0 %v1466_v1  ;;  %s1459_s16 = sshll.u32 %s465_s15, 5  ;;  %s1461_s23 = sshll.u32 %s465_s15, 2  ;;  %v1547_v12 = vld [vmem:[%s1954_s7] ss:$0 sm:$0xff]  ;;  %v1495_v18 = vld [vmem:[%s1952_s5 + $0x78] sm:$0xff]  ;;  %v1486_v19 = vld [vmem:[%s1952_s5 + $0x30] sm:$0xff] }
  0x1a   : > { %s1749_s20 = scalar_lea.vmem %s1947_s0, %s1459_s16  ;;  %s1460_s24 = sshll.u32 %s465_s15, 3  ;;  %v1474_v17 = vld [vmem:[%s1956_s9] sm:$0xff]  ;;  %v1494_v21 = vld [vmem:[%s1952_s5 + $0x70] sm:$0xff]  ;;  %v1485_v22 = vld [vmem:[%s1952_s5 + $0x28] sm:$0xff]  ;;  %vm1139_vm5 = vcmask 785408  }
  0x1b   : > { %v1464_v4 = vld [vmem:[%s1749_s20 + $0x10] sm:$0xff]  ;;  %s478_s14 = scalar_lea.vmem %s1949_s2, %s1461_s23  ;;  %s473_s22 = scalar_lea.vmem %s1948_s1, %s1460_s24  ;;  %v1465_v8 = vld [vmem:[%s1749_s20 + $0x18] sm:$0xff]  ;;  %v1462_v10 = vld [vmem:[%s1749_s20] sm:$0xff] }
  0x1c   : > { %622 = vmatpush.bf16.msra.mxu1 %v1472_v2  ;;  %v817_v5 = vld [vmem:[%s478_s14] sm:$0xf]  ;;  %1283 = vmatmul.msk.bf16.vlgmr.msra.gmra.mxu2 %vm520_vm0, %v1464_v4  ;;  %v1463_v20 = vld [vmem:[%s1749_s20 + $0x8] sm:$0xff]  ;;  %v1483_v26 = vld [vmem:[%s1952_s5 + $0x18] sm:$0xff]  ;;  %s1502_s3 = sshll.u32 %s1708_s29, 6  ;;  %s1149_s29 = scalar_lea.sflag [#allocation3], %s461_s27 }
  0x1d   : > { %855 = vst [vmem:[#allocation1] ss:$4 sm:$0xff] %v817_v5  ;;  %v1469_v7 = vld [vmem:[%s473_s22] sm:$0xff]  ;;  %1281 = vmatmul.msk.bf16.vlgmr.msra.gmra.mxu0 %vm520_vm0, %v1462_v10  ;;  %v1493_v23 = vld [vmem:[%s1952_s5 + $0x68] sm:$0xff]  ;;  %v1491_v28 = vld [vmem:[%s1952_s5 + $0x58] sm:$0xff]  ;;  %s1894_s22 = scalar_lea.vmem [#allocation2], %s1254_s17  ;;  %s1160_s23 = scalar_lea.hbm %s1960_s13, %s1502_s3 }
  0x1e   : > { %956 = vmatpush.bf16.msrb.mxu0 %v1487_v11  ;;  %v1484_v24 = vld [vmem:[%s1952_s5 + $0x20] sm:$0xff]  ;;  %v1475_v27 = vld [vmem:[%s1956_s9 + $0x8] sm:$0xff]  ;;  %v1482_v29 = vld [vmem:[%s1952_s5 + $0x10] sm:$0xff]  ;;  %s1161_s24 = sshll.u32 %s1894_s22, 4  ;;  %s1163_s30 = sshll.u32 %s1160_s23, 4  ;;  %s1162_s24 = int_to_ptr.vmem [resolvable:$true] %s1161_s24  ;;  %s1164_s30 = int_to_ptr.hbm [resolvable:$true] %s1163_s30 }
  0x1f   : > { %v1492_v25 = vld [vmem:[%s1952_s5 + $0x60] sm:$0xff]  ;;  %v1490_v30 = vld [vmem:[%s1952_s5 + $0x50] sm:$0xff]  ;;  %v1481_v31 = vld [vmem:[%s1952_s5 + $0x8] sm:$0xff]  ;;  %s1565_s20 = sshra.s32 %s1164_s30, 4  ;;  %s1571_s3 = scalar_lea.hbm %s1960_s13, 128  ;;  %s1566_s20 = int_to_ptr.hbm [resolvable:$true] %s1565_s20 }
  0x20   : > { %623 = vmatpush.bf16.msra.mxu1 %v1471_v3  ;;  %v1489_v32 = vld [vmem:[%s1952_s5 + $0x48] sm:$0xff]  ;;  %v1480_v33 = vld [vmem:[%s1952_s5] sm:$0xff]  ;;  %v1476_v36 = vld [vmem:[%s1956_s9 + $0x10] sm:$0xff]  ;;  %s1567_s17 = scalar_lea.hbm %s1566_s20, 64  ;;  %p1572_p0 = scmp.lt.s32.totalorder %s1566_s20, %s1960_s13 }
  0x21   : > { %v1488_v34 = vld [vmem:[%s1952_s5 + $0x40] sm:$0xff]  ;;  %v1477_v43 = vld [vmem:[%s1956_s9 + $0x18] sm:$0xff]  ;;  %v1478_v46 = vld [vmem:[%s1958_s11 + $0x10] sm:$0xff]  ;;  %p1568_p11 = scmp.ne.s32.totalorder %s1566_s20, %s1567_s17  ;;  %p1573_p1 = scmp.lt.s32.totalorder %s1571_s3, %s1567_s17 }
  0x22   : > { %957 = vmatpush.bf16.msrb.mxu0 %v1486_v19  ;;  %v1548_v38 = vld [vmem:[%s1953_s6] ss:$0 sm:$0xff]  ;;  %v1479_v45 = vld [vmem:[%s1958_s11 + $0x18] sm:$0xff]  ;;  %v1468_v48 = vld [vmem:[%s1958_s11 + $0x8] sm:$0xff] }
  0x23   : > { %1504 = vmatpush.bf16.msra.mxu3 %v1479_v45  ;;  %v1467_v50 = vld [vmem:[%s1958_s11] sm:$0xff]  ;;  %p1569_p12 = pnand %p1568_p11, %p1725_p5  ;;  %p1574_p2 = por %p1573_p1, %p1572_p0 }
  0x24   : > { %624 = vmatpush.bf16.msra.mxu1 %v1470_v6  ;;  %v856_v35 = vld.sshfl [vmem:[#allocation1] sm:$0xff pattern:$0x73625140]  ;;  %v857_v44 = vld.sshfl [vmem:[#allocation1 + $0x8] sm:$0xff pattern:$0x73625140] }
  0x25   : > { %v1549_v10 = vld [vmem:[%s1955_s8] ss:$0 sm:$0xff]  ;;  %p1570_p13 = pneg %p1569_p12 }
  0x26   : > { %958 = vmatpush.bf16.msrb.mxu0 %v1485_v22  ;;  %v1496_v19 = vld [vmem:[%s1957_s10] sm:$0xff]  ;;  %v1497_v22 = vld [vmem:[%s1957_s10 + $0x8] sm:$0xff] }
  0x27   : > { %1305 = vmatmul.msk.bf16.vlgmr.msra.gmra.mxu1 %vm613_vm1, %v1469_v7  ;;  %1505 = vmatpush.bf16.msra.mxu3 %v1478_v46  ;;  %p1575_p3 = pnand %p1574_p2, %p1570_p13 }
  0x28   : > { %741 = vmatpush.bf16.msrb.mxu1 %v1479_v45 }
  0x2a   : > { %959 = vmatpush.bf16.msrb.mxu0 %v1484_v24  ;;  %v1499_v24 = vld [vmem:[%s1957_s10 + $0x18] sm:$0xff] }
  0x2c   : > { %1284 = vmatmul.msk.bf16.gmra.mxu2 %vm520_vm0, %v1465_v8  ;;  %742 = vmatpush.bf16.msrb.mxu1 %v1478_v46 }
  0x2d   : > { %1282 = vmatmul.msk.bf16.gmra.mxu0 %vm520_vm0, %v1463_v20 }
  0x2e   : > { %960 = vmatpush.bf16.msrb.mxu0 %v1483_v26 }
  0x30   : > { %794 = vmatpush.bf16.msra.mxu1 %v1468_v48 }
  0x32   : > { %961 = vmatpush.bf16.msrb.mxu0 %v1482_v29  ;;  %v1500_v29 = vld [vmem:[%s1958_s11 + $0x20] sm:$0xff] }
  0x34   : > { %795 = vmatpush.bf16.msra.mxu1 %v1467_v50  ;;  %v1550_v50 = vld [vmem:[%s1959_s12] ss:$0 sm:$0xff] }
  0x36   : > { %962 = vmatpush.bf16.msrb.mxu0 %v1481_v31 }
  0x3a   : > { %963 = vmatpush.bf16.msrb.mxu0 %v1480_v33 }
  0x3d   : > { %964 = vmatmul.bf16.vlgmr.msrb.gmra.mxu0 %v856_v35 }
  0x9a   : > { %v542_v49 = vpop.f32.mrf.mxu0 }
  0x9b   : > { %v543_v59 = vadd.f32 %v1548_v38, %v542_v49 }
  0x9f   : > { %v552_v37 = vpop.f32.mrf.mxu2 }
  0xa0   : > { %v553_v39 = vadd.f32 %v1548_v38, %v552_v37 }
  0xa2   : > { %v544_v52 = vpop.f32.mrf.mxu0 }
  0xa3   : > { %v545_v60 = vadd.f32 %v1548_v38, %v544_v52 }
  0xa4   : > { %v626_v9 = vpop.f32.mrf.mxu1 }
  0xa5   : > { %v627_v14 = vadd.f32 %v1547_v12, %v626_v9  ;;  %v562_v61 = vpack.c.bf16 %v545_v60, %v543_v59 }
  0xa7   : > { %v554_v40 = vpop.f32.mrf.mxu2 }
  0xa8   : > { %v555_v41 = vadd.f32 %v1548_v38, %v554_v40 }
  0xaa   : > { %v564_v42 = vpack.c.bf16 %v555_v41, %v553_v39  ;;  %v547_v54 = vpop.f32.mrf.mxu0 }
  0xab   : > { %v548_v3 = vadd.f32 %v1548_v38, %v547_v54 }
  0xac   : > { %v628_v13 = vpop.f32.mrf.mxu1 }
  0xad   : > { %v629_v15 = vadd.f32 %v1547_v12, %v628_v13 }
  0xaf   : > { %v639_v16 = vpack.c.bf16 %v629_v15, %v627_v14  ;;  %v557_v47 = vpop.f32.mrf.mxu2 }
  0xb1   : > { %679 = vmatpush.bf16.msrb.mxu2 %v639_v16  ;;  %v558_v16 = vadd.f32 %v1548_v38, %v557_v47 }
  0xb2   : > { %v549_v57 = vpop.f32.mrf.mxu0 }
  0xb3   : > { %v550_v4 = vadd.f32 %v1548_v38, %v549_v57 }
  0xb4   : > { %1322 = vmatmul.msk.bf16.vlgmr.msrb.gmra.mxu2 %vm520_vm0, %v1474_v17 }
  0xb5   : > { %969 = vmatpush.bf16.msra.mxu2 %v1495_v18  ;;  %v563_v5 = vpack.c.bf16 %v550_v4, %v548_v3 }
  0xb7   : > { %v559_v51 = vpop.f32.mrf.mxu2 }
  0xb8   : > { %v560_v17 = vadd.f32 %v1548_v38, %v559_v51 }
  0xb9   : > { %970 = vmatpush.bf16.msra.mxu2 %v1494_v21 }
  0xba   : > { %v965_v62 = vpop.f32.mrf.mxu0  ;;  %v565_v21 = vpack.c.bf16 %v560_v17, %v558_v16 }
  0xbb   : > { %v966_v12 = vadd.f32 %v1549_v10, %v965_v62 }
  0xbd   : > { %971 = vmatpush.bf16.msra.mxu2 %v1493_v23  ;;  %v1498_v23 = vld [vmem:[%s1957_s10 + $0x10] sm:$0xff] }
  0xc1   : > { %972 = vmatpush.bf16.msra.mxu2 %v1492_v25 }
  0xc2   : > { %v967_v1 = vpop.f32.mrf.mxu0 }
  0xc4   : > { %1323 = vmatmul.msk.bf16.gmra.mxu2 %vm520_vm0, %v1475_v27 }
  0xc5   : > { %973 = vmatpush.bf16.msra.mxu2 %v1491_v28  ;;  %v1501_v28 = vld [vmem:[%s1958_s11 + $0x28] sm:$0xff] }
  0xc6   : > { %1096 = vmatpush.bf16.msra.mxu0 %v1501_v28 }
  0xc9   : > { %974 = vmatpush.bf16.msra.mxu2 %v1490_v30 }
  0xca   : > { %1097 = vmatpush.bf16.msra.mxu0 %v1500_v29 }
  0xcd   : > { %975 = vmatpush.bf16.msra.mxu2 %v1489_v32 }
  0xd1   : > { %976 = vmatpush.bf16.msra.mxu2 %v1488_v34 }
  0xd4   : > { %1324 = vmatmul.msk.bf16.gmra.mxu2 %vm520_vm0, %v1476_v36 }
  0xe4   : > { %1325 = vmatmul.msk.bf16.gmra.mxu2 %vm520_vm0, %v1477_v43 }
  0xf4   : > { %977 = vmatmul.bf16.vlgmr.msra.gmra.mxu2 %v857_v44 }
 0x137   : > { %v681_v53 = vpop.f32.mrf.mxu2 }
 0x13f   : > { %v683_v55 = vpop.f32.mrf.mxu2 }
 0x140   : > { %v701_v56 = vpack.c.bf16 %v683_v55, %v681_v53 }
 0x142   : > { %1338 = vmatmul.msk.bf16.vlgmr.msrb.gmra.mxu1 %vm722_vm2, %v701_v56 }
 0x147   : > { %v686_v58 = vpop.f32.mrf.mxu2 }
 0x14f   : > { %v688_v63 = vpop.f32.mrf.mxu2 }
 0x150   : > { %v702_v0 = vpack.c.bf16 %v688_v63, %v686_v58 }
 0x152   : > { %1339 = vmatmul.msk.bf16.vlgmr.msra.gmra.mxu3 %vm722_vm2, %v702_v0  ;;  %1350 = vmatmul.msk.bf16.vlgmr.msra.gmra.mxu1 %vm722_vm2, %v562_v61 }
 0x157   : > { %v691_v2 = vpop.f32.mrf.mxu2 }
 0x15f   : > { %v693_v6 = vpop.f32.mrf.mxu2 }
 0x160   : > { %v703_v7 = vpack.c.bf16 %v693_v6, %v691_v2 }
 0x162   : > { %1340 = vmatmul.msk.bf16.gmra.mxu3 %vm722_vm2, %v703_v7  ;;  %1351 = vmatmul.msk.bf16.gmra.mxu1 %vm722_vm2, %v563_v5 }
 0x167   : > { %v696_v8 = vpop.f32.mrf.mxu2 }
 0x16f   : > { %v698_v9 = vpop.f32.mrf.mxu2 }
 0x170   : > { %v704_v11 = vpack.c.bf16 %v698_v9, %v696_v8 }
 0x172   : > { %1341 = vmatmul.msk.bf16.gmra.mxu3 %vm722_vm2, %v704_v11  ;;  %1352 = vmatmul.msk.bf16.gmra.mxu1 %vm722_vm2, %v564_v42 }
 0x177   : > { %v978_v13 = vpop.f32.mrf.mxu2 }
 0x178   : > { %v979_v14 = vadd.f32 %v978_v13, %v966_v12 }
 0x17a   : > { %v990_v15 = vpack.c.bf16 %v979_v14, %v979_v14 }
 0x17c   : > { %v1026_v18 = vsel %vm1024_vm3, %v990_v15, 0 }
 0x17d   : > { %1035 = vmatpush.bf16.msrb.mxu3 %v1026_v18 }
 0x17f   : > { %v980_v20 = vpop.f32.mrf.mxu2 }
 0x182   : > { %1353 = vmatmul.msk.bf16.gmra.mxu1 %vm722_vm2, %v565_v21  ;;  %1434 = vmatmul.msk.bf16.vlgmr.msrb.gmra.mxu3 %vm1011_vm4, %v1496_v19 }
 0x192   : > { %1435 = vmatmul.msk.bf16.gmra.mxu3 %vm1011_vm4, %v1497_v22 }
 0x1a2   : > { %1436 = vmatmul.msk.bf16.gmra.mxu3 %vm1011_vm4, %v1498_v23 }
 0x1b2   : > { %1437 = vmatmul.msk.bf16.gmra.mxu3 %vm1011_vm4, %v1499_v24 }
 0x1bf   : > { %v744_v45 = vpop.f32.mrf.mxu1 }
 0x1c7   : > { %v746_v46 = vpop.f32.mrf.mxu1 }
 0x1cf   : > { %v797_v47 = vpop.f32.mrf.mxu1 }
 0x1d0   : > { %v798_v49 = vadd.f32 %v797_v47, %v744_v45 }
 0x1d5   : > { %v749_v25 = vpop.f32.mrf.mxu3 }
 0x1d7   : > { %v799_v48 = vpop.f32.mrf.mxu1 }
 0x1d8   : > { %v800_v55 = vadd.f32 %v799_v48, %v746_v46 }
 0x1dd   : > { %v751_v26 = vpop.f32.mrf.mxu3 }
 0x1df   : > { %v802_v53 = vpop.f32.mrf.mxu1 }
 0x1e0   : > { %v803_v60 = vadd.f32 %v802_v53, %v749_v25 }
 0x1e5   : > { %v754_v27 = vpop.f32.mrf.mxu3 }
 0x1e7   : > { %v804_v59 = vpop.f32.mrf.mxu1 }
 0x1e8   : > { %v805_v1 = vadd.f32 %v804_v59, %v751_v26 }
 0x1ed   : > { %v756_v30 = vpop.f32.mrf.mxu3 }
 0x1ef   : > { %v807_v0 = vpop.f32.mrf.mxu1 }
 0x1f0   : > { %v808_v5 = vadd.f32 %v807_v0, %v754_v27 }
 0x1f5   : > { %v759_v31 = vpop.f32.mrf.mxu3 }
 0x1f7   : > { %v809_v6 = vpop.f32.mrf.mxu1 }
 0x1f8   : > { %v810_v10 = vadd.f32 %v809_v6, %v756_v30 }
 0x1fd   : > { %v1882_v32 = vpop.f32.mrf.mxu3 }
 0x1ff   : > { %v812_v13 = vpop.f32.mrf.mxu1 }
 0x200   : > { %v813_v15 = vadd.f32 %v812_v13, %v759_v31 }
 0x205   : > { %v1037_v33 = vpop.f32.mrf.mxu3 }
 0x207   : > { %v814_v19 = vpop.f32.mrf.mxu1 }
 0x208   : > { %v815_v20 = vadd.f32 %v814_v19, %v1882_v32 }
 0x20d   : > { %v1039_v34 = vpop.f32.mrf.mxu3 }
 0x20e   : > { %v1057_v35 = vpack.c.bf16 %v1039_v34, %v1037_v33 }
 0x210   : > { %1450 = vmatmul.msk.bf16.vlgmr.msra.gmra.mxu0 %vm722_vm2, %v1057_v35 }
 0x215   : > { %v1042_v36 = vpop.f32.mrf.mxu3 }
 0x21d   : > { %v1044_v37 = vpop.f32.mrf.mxu3 }
 0x21e   : > { %v1058_v38 = vpack.c.bf16 %v1044_v37, %v1042_v36 }
 0x220   : > { %1451 = vmatmul.msk.bf16.gmra.mxu0 %vm722_vm2, %v1058_v38 }
 0x225   : > { %v1047_v39 = vpop.f32.mrf.mxu3 }
 0x22d   : > { %v1049_v40 = vpop.f32.mrf.mxu3 }
 0x22e   : > { %v1059_v41 = vpack.c.bf16 %v1049_v40, %v1047_v39 }
 0x230   : > { %1452 = vmatmul.msk.bf16.gmra.mxu0 %vm722_vm2, %v1059_v41 }
 0x235   : > { %v1052_v42 = vpop.f32.mrf.mxu3 }
 0x23d   : > { %v1054_v43 = vpop.f32.mrf.mxu3 }
 0x23e   : > { %v1060_v44 = vpack.c.bf16 %v1054_v43, %v1052_v42 }
 0x240   : > { %1453 = vmatmul.msk.bf16.gmra.mxu0 %vm722_vm2, %v1060_v44 }
 0x28d   : > { %v1099_v51 = vpop.f32.mrf.mxu0 }
 0x28e   : > { %v1119_v52 = vadd.f32 %v1099_v51, %v798_v49 }
 0x290   : > { %v1131_v54 = vadd.f32 %v1550_v50, %v1119_v52 }
 0x292   : > { %1140 = vst.msk [vmem:[%s1894_s22] sm:$0xff] %vm1139_vm5, %v1131_v54 }
 0x295   : > { %v1101_v56 = vpop.f32.mrf.mxu0 }
 0x296   : > { %v1120_v57 = vadd.f32 %v1101_v56, %v800_v55 }
 0x298   : > { %v1132_v58 = vadd.f32 %v1550_v50, %v1120_v57 }
 0x29a   : > { %1141 = vst.msk [vmem:[%s1894_s22 + $0x8] sm:$0xff] %vm1139_vm5, %v1132_v58 }
 0x29d   : > { %v1104_v61 = vpop.f32.mrf.mxu0 }
 0x29e   : > { %v1121_v62 = vadd.f32 %v1104_v61, %v803_v60 }
 0x2a0   : > { %v1133_v63 = vadd.f32 %v1550_v50, %v1121_v62 }
 0x2a2   : > { %1142 = vst.msk [vmem:[%s1894_s22 + $0x10] sm:$0xff] %vm1139_vm5, %v1133_v63 }
 0x2a5   : > { %v1106_v2 = vpop.f32.mrf.mxu0 }
 0x2a6   : > { %v1122_v3 = vadd.f32 %v1106_v2, %v805_v1 }
 0x2a8   : > { %v1134_v4 = vadd.f32 %v1550_v50, %v1122_v3 }
 0x2aa   : > { %1143 = vst.msk [vmem:[%s1894_s22 + $0x18] sm:$0xff] %vm1139_vm5, %v1134_v4 }
 0x2ad   : > { %v1109_v7 = vpop.f32.mrf.mxu0 }
 0x2ae   : > { %v1123_v8 = vadd.f32 %v1109_v7, %v808_v5 }
 0x2b0   : > { %v1135_v9 = vadd.f32 %v1550_v50, %v1123_v8 }
 0x2b2   : > { %1144 = vst.msk [vmem:[%s1894_s22 + $0x20] sm:$0xff] %vm1139_vm5, %v1135_v9 }
 0x2b5   : > { %v1111_v11 = vpop.f32.mrf.mxu0 }
 0x2b6   : > { %v1124_v12 = vadd.f32 %v1111_v11, %v810_v10 }
 0x2b8   : > { %v1136_v14 = vadd.f32 %v1550_v50, %v1124_v12 }
 0x2ba   : > { %1145 = vst.msk [vmem:[%s1894_s22 + $0x28] sm:$0xff] %vm1139_vm5, %v1136_v14 }
 0x2bd   : > { %v1114_v16 = vpop.f32.mrf.mxu0 }
 0x2be   : > { %v1125_v17 = vadd.f32 %v1114_v16, %v813_v15 }
 0x2c0   : > { %v1137_v18 = vadd.f32 %v1550_v50, %v1125_v17 }
 0x2c2   : > { %1146 = vst.msk [vmem:[%s1894_s22 + $0x30] sm:$0xff] %vm1139_vm5, %v1137_v18 }
 0x2c5   : > { %v1116_v21 = vpop.f32.mrf.mxu0 }
 0x2c6   : > { %v1126_v22 = vadd.f32 %v1116_v21, %v815_v20 }
 0x2c8   : > { %v1138_v23 = vadd.f32 %v1550_v50, %v1126_v22 }
 0x2ca   : > { %1147 = vst.msk [vmem:[%s1894_s22 + $0x38] sm:$0xff] %vm1139_vm5, %v1138_v23 }
 0x2cb   : > { %1578 = shalt.err (!%p1575_p3)
}
 0x2cc   : > { %s1615_s27 = smov 128   ;;  %s1616_s22 = smov 8  }
 0x2cd   : > { %1506 = dma.vmem_to_hbm [thread:$0]  (%p1725_p5), %s1162_s24, 1024, %s1164_s30, %s1149_s29, %s1615_s27, %s1615_s27, %s1616_s22  }
 0x2ce PF: > { %p1512_p4 = scmp.ge.s32.totalorder %s1613_s28, 2  ;;  %s1178_s23 = sand.u32 1, %s1601_s25  }
 0x2cf   : > { %s1179_s16 = scalar_lea.sflag [#allocation3], %s1178_s23 }
 0x2d0   : > { %p1509_p7 = pnand %p1512_p4, %p1729_p6 }
 0x2d2   : > { %p1510_p8 = pneg %p1509_p7 }
 0x2d4   : > { %1596 = dma.done.wait (%p1510_p8), %s1179_s16, 1024  }
 0x2d5   : > { %1598 = vsyncadd (%p1510_p8), %s1179_s16, 4294966272  ;;  %s1971_s28 = sld [smem:[#allocation6_spill]]  ;;  %s1974_s25 = smov %s1605_s26 }
 0x2d6   : > { %s1972_s20 = sld [smem:[#allocation5_spill]] }
 0x2d7   : > { %s1973_s27 = sld [smem:[#allocation7_spill]] }
 0x2db   : > { %p23_p9 = scmp.ge.s32.totalorder %s1971_s28, 4  }
 0x2dc   : > { %s1975_s26 = smov %s1972_s20 }
 0x2dd   :  { %25 = sbr.rel (!%p23_p9) target bundleno = 5 (0x5), region = 115 }
 0x2e2   :  { %1185 = vsyncpa [#allocation3], 1 }
 0x2e3   :  { %1187 = vsyncpa [#allocation3 + $0x1], 1 }

</bundles_post_ra>
